<compile_context>
chip_gen: v5e
topology: v5e:2x2
jax: 0.10.0
libtpu: 0.0.40
codegen_flags: <defaults>
</compile_context>

<pallas_src>
import jax
import jax.numpy as jnp
from jax import lax
from jax.experimental import pallas as pl
from jax.experimental.pallas import tpu as pltpu


def _round_up(x, m):
    return ((x + m - 1) // m) * m


# ----------------------------------------------------------------------------
# Kernel: single invocation, T decode steps inside.
# ----------------------------------------------------------------------------
def decoder_decode_kernel(tok_ref,       # scalar prefetch: (T,) int32 in SMEM
                          h0_ref,        # (1, Hp)    initial hidden state
                          emb_ref,       # (Vr, Hp)   embedding table (resident)
                          w_ih_t_ref,    # (Hp, 3Hp)  GRU input weight^T  [r|z|n]
                          b_ih_ref,      # (1, 3Hp)
                          w_hh_t_ref,    # (Hp, 3Hp)  GRU hidden weight^T [r|z|n]
                          b_hh_ref,      # (1, 3Hp)
                          w_out_t_ref,   # (Hp, Vp)   output Linear weight^T
                          b_out_ref,     # (1, Vp)
                          logits_ref,    # (T, Vp)    out: per-step logits
                          h_out_ref,     # (1, Hp)    out: final hidden
                          x_buf,         # VMEM (T, Hp)   gathered embeddings
                          gi_buf,        # VMEM (T, 3Hp)  hoisted input gates
                          h_all):        # VMEM (T, Hp)   all hidden states
    T, Hp = h_all.shape

    # ---- Prologue (no dependence on h): gather rows, ReLU, input-side gates. ----
    def gather(t, carry):
        x_buf[pl.ds(t, 1), :] = emb_ref[pl.ds(tok_ref[t], 1), :]
        return carry

    lax.fori_loop(0, T, gather, 0, unroll=True)

    gi_buf[...] = (jnp.dot(jnp.maximum(x_buf[...], 0.0), w_ih_t_ref[...],
                           preferred_element_type=jnp.float32)
                   + b_ih_ref[...])                                   # (T, 3Hp)

    # ---- Recurrence: only the h-dependent matvec stays in the serial chain. ----
    def step(t, h):
        gi = gi_buf[pl.ds(t, 1), :]                                   # (1, 3Hp)
        gh = (jnp.dot(h, w_hh_t_ref[...],
                      preferred_element_type=jnp.float32)
              + b_hh_ref[...])                                        # (1, 3Hp)
        r = jax.nn.sigmoid(gi[:, 0 * Hp:1 * Hp] + gh[:, 0 * Hp:1 * Hp])
        z = jax.nn.sigmoid(gi[:, 1 * Hp:2 * Hp] + gh[:, 1 * Hp:2 * Hp])
        n = jnp.tanh(gi[:, 2 * Hp:3 * Hp] + r * gh[:, 2 * Hp:3 * Hp])
        h_new = (1.0 - z) * n + z * h                                 # (1, Hp)
        h_all[pl.ds(t, 1), :] = h_new
        return h_new

    h_final = lax.fori_loop(0, T, step, h0_ref[...], unroll=True)
    h_out_ref[...] = h_final

    # ---- Epilogue: one batched output projection, one lane-dense writeback. ----
    logits_ref[...] = (jnp.dot(h_all[...], w_out_t_ref[...],
                               preferred_element_type=jnp.float32)
                       + b_out_ref[...])


# ----------------------------------------------------------------------------
# Host-side parameter preparation: pad / transpose (done once).
# ----------------------------------------------------------------------------
def prepare_decoder_params(params):
    V, H = params["embedding"].shape
    Hp = _round_up(H, 128)          # lane-dense hidden
    Vp = _round_up(V, 128)          # lane-dense vocab (logits / out weight)
    Vr = _round_up(V, 8)            # sublane-padded embedding rows
    f32 = jnp.float32

    # NOTE: all padded regions below MUST stay exactly 0 (see padded-lane
    # invariant in the header comment); they are, since everything is built
    # from jnp.zeros + .at[...].set of the real sub-blocks.
    emb = jnp.zeros((Vr, Hp), f32).at[:V, :H].set(params["embedding"].astype(f32))

    def pad_gates_w(w):                         # (3H, H) -> (Hp, 3Hp): W^T, zero pad
        wt = w.astype(f32).T                    # (H, 3H), gate order [r | z | n]
        out = jnp.zeros((Hp, 3 * Hp), f32)
        for g in range(3):
            out = out.at[:H, g * Hp:g * Hp + H].set(wt[:, g * H:(g + 1) * H])
        return out

    def pad_gates_b(b):                         # (3H,) -> (1, 3Hp), zero pad
        out = jnp.zeros((1, 3 * Hp), f32)
        for g in range(3):
            out = out.at[0, g * Hp:g * Hp + H].set(b.astype(f32)[g * H:(g + 1) * H])
        return out

    w_ih_t = pad_gates_w(params["w_ih"])
    w_hh_t = pad_gates_w(params["w_hh"])
    b_ih = pad_gates_b(params["b_ih"])
    b_hh = pad_gates_b(params["b_hh"])

    w_out_t = jnp.zeros((Hp, Vp), f32).at[:H, :V].set(params["w_out"].astype(f32).T)
    b_out = jnp.zeros((1, Vp), f32).at[0, :V].set(params["b_out"].astype(f32))

    return dict(V=V, H=H, Hp=Hp, Vp=Vp, Vr=Vr, emb=emb,
                w_ih_t=w_ih_t, b_ih=b_ih, w_hh_t=w_hh_t, b_hh=b_hh,
                w_out_t=w_out_t, b_out=b_out)


# ----------------------------------------------------------------------------
# Multi-step decode: T teacher-forced Decoder.forward steps in ONE pallas_call.
# ----------------------------------------------------------------------------
def decoder_decode(params, tokens, hidden, prepared=None):
    p = prepared if prepared is not None else prepare_decoder_params(params)
    V, H, Hp, Vp, Vr = p["V"], p["H"], p["Hp"], p["Vp"], p["Vr"]

    tokens = jnp.asarray(tokens, jnp.int32).reshape(-1)
    T = int(tokens.shape[0])
    h0 = jnp.zeros((1, Hp), jnp.float32).at[0, :H].set(
        jnp.asarray(hidden, jnp.float32).reshape(H))

    grid_spec = pltpu.PrefetchScalarGridSpec(
        num_scalar_prefetch=1,
        grid=(1,),                               # whole decode in one invocation
        in_specs=[
            pl.BlockSpec((1, Hp), lambda i, tok: (0, 0)),           # h0
            pl.BlockSpec((Vr, Hp), lambda i, tok: (0, 0)),          # embedding
            pl.BlockSpec((Hp, 3 * Hp), lambda i, tok: (0, 0)),      # W_ih^T
            pl.BlockSpec((1, 3 * Hp), lambda i, tok: (0, 0)),       # b_ih
            pl.BlockSpec((Hp, 3 * Hp), lambda i, tok: (0, 0)),      # W_hh^T
            pl.BlockSpec((1, 3 * Hp), lambda i, tok: (0, 0)),       # b_hh
            pl.BlockSpec((Hp, Vp), lambda i, tok: (0, 0)),          # W_out^T
            pl.BlockSpec((1, Vp), lambda i, tok: (0, 0)),           # b_out
        ],
        out_specs=[
            pl.BlockSpec((T, Vp), lambda i, tok: (0, 0)),           # all logits
            pl.BlockSpec((1, Hp), lambda i, tok: (0, 0)),           # final hidden
        ],
        scratch_shapes=[
            pltpu.VMEM((T, Hp), jnp.float32),       # gathered embeddings
            pltpu.VMEM((T, 3 * Hp), jnp.float32),   # hoisted input gates GI
            pltpu.VMEM((T, Hp), jnp.float32),       # all hidden states
        ],
    )

    logits_pad, h_pad = pl.pallas_call(
        decoder_decode_kernel,
        grid_spec=grid_spec,
        out_shape=(jax.ShapeDtypeStruct((T, Vp), jnp.float32),
                   jax.ShapeDtypeStruct((1, Hp), jnp.float32)),
        compiler_params=pltpu.CompilerParams(
            dimension_semantics=("arbitrary",),
            vmem_limit_bytes=32 * 1024 * 1024),
    )(tokens, h0, p["emb"], p["w_ih_t"], p["b_ih"], p["w_hh_t"], p["b_hh"],
      p["w_out_t"], p["b_out"])

    logits = logits_pad[:, :V]                      # drop zero-padded vocab lanes
    h_new = h_pad[:, :H].reshape(1, 1, H)
    return logits, h_new


def decoder_forward(params, token, hidden, prepared=None):
    """Equivalent of Decoder.forward(input, hidden) -> (logits (1,V), hidden (1,1,H))."""
    tokens = jnp.asarray(token, jnp.int32).reshape(1)
    return decoder_decode(params, tokens, hidden, prepared)


def init_hidden(params, enc_feat):
    """Equivalent of Decoder.initHidden(input) — plain-JAX glue (single tiny Linear)."""
    h = enc_feat @ params["linear_w"].T + params["linear_b"]
    return h.reshape(1, 1, -1)


# ----------------------------------------------------------------------------
# Plain-JAX reference of one PyTorch Decoder.forward step (for validation).
# ----------------------------------------------------------------------------
def decoder_forward_ref(params, token, hidden):
    H = params["w_hh"].shape[1]
    x = jnp.maximum(params["embedding"][token], 0.0).reshape(1, H)
    h = hidden.reshape(1, H)
    gi = x @ params["w_ih"].T + params["b_ih"]
    gh = h @ params["w_hh"].T + params["b_hh"]
    r = jax.nn.sigmoid(gi[:, :H] + gh[:, :H])
    z = jax.nn.sigmoid(gi[:, H:2 * H] + gh[:, H:2 * H])
    n = jnp.tanh(gi[:, 2 * H:] + r * gh[:, 2 * H:])
    h_new = (1.0 - z) * n + z * h
    logits = h_new @ params["w_out"].T + params["b_out"]
    return logits, h_new.reshape(1, 1, H)


if __name__ == "__main__":
    # Small shapes: encoderImage_size=64, input_size (vocab)=40, hidden_size=32.
    E, V, H = 64, 40, 32
    T = 6
    key = jax.random.PRNGKey(0)
    ks = jax.random.split(key, 11)
    s_h = 1.0 / (H ** 0.5)
    s_e = 1.0 / (E ** 0.5)

    params = {
        "embedding": jax.random.normal(ks[0], (V, H), jnp.float32),
        "w_ih": jax.random.uniform(ks[1], (3 * H, H), jnp.float32, -s_h, s_h),
        "w_hh": jax.random.uniform(ks[2], (3 * H, H), jnp.float32, -s_h, s_h),
        "b_ih": jax.random.uniform(ks[3], (3 * H,), jnp.float32, -s_h, s_h),
        "b_hh": jax.random.uniform(ks[4], (3 * H,), jnp.float32, -s_h, s_h),
        "w_out": jax.random.uniform(ks[5], (V, H), jnp.float32, -s_h, s_h),
        "b_out": jax.random.uniform(ks[6], (V,), jnp.float32, -s_h, s_h),
        "linear_w": jax.random.uniform(ks[7], (H, E), jnp.float32, -s_e, s_e),
        "linear_b": jax.random.uniform(ks[8], (H,), jnp.float32, -s_e, s_e),
    }

    enc_feat = jax.random.normal(ks[9], (1, E), jnp.float32)   # encoded image features
    hidden0 = init_hidden(params, enc_feat)                    # (1, 1, H)
    tokens = jax.random.randint(ks[10], (T,), 0, V, jnp.int32)

    prepared = prepare_decoder_params(params)

    # Whole T-step teacher-forced decode in a single pallas_call / kernel invocation.
    logits_all, hidden_T = decoder_decode(params, tokens, hidden0, prepared)
    jax.block_until_ready((logits_all, hidden_T))
    assert logits_all.shape == (T, V), logits_all.shape
    assert hidden_T.shape == (1, 1, H), hidden_T.shape

    # Single-step API matching Decoder.forward(input, hidden).
    logits1, hidden1 = decoder_forward(params, tokens[0], hidden0, prepared)
    jax.block_until_ready((logits1, hidden1))
    assert logits1.shape == (1, V), logits1.shape
    assert hidden1.shape == (1, 1, H), hidden1.shape

    # Validate against the plain-JAX reference of the PyTorch module (tight f32 tol).
    h_ref = hidden0
    ref_logits = []
    for t in range(T):
        lg, h_ref = decoder_forward_ref(params, int(tokens[t]), h_ref)
        ref_logits.append(lg)
    ref_logits = jnp.concatenate(ref_logits, axis=0)
    assert jnp.allclose(logits_all, ref_logits, atol=1e-4, rtol=1e-4), \
        float(jnp.max(jnp.abs(logits_all - ref_logits)))
    assert jnp.allclose(hidden_T, h_ref, atol=1e-4, rtol=1e-4), \
        float(jnp.max(jnp.abs(hidden_T - h_ref)))
    assert jnp.allclose(logits1, ref_logits[:1], atol=1e-4, rtol=1e-4)

    print("KERNEL_OK")
</pallas_src>

<mosaic_0001>
module attributes {stable_mosaic.version = 11 : i64} {
  func.func @decoder_decode_kernel(%arg0: i32, %arg1: memref<6xi32, #tpu.memory_space<smem>>, %arg2: memref<1x128xf32, #tpu.memory_space<vmem>>, %arg3: memref<40x128xf32, #tpu.memory_space<vmem>>, %arg4: memref<128x384xf32, #tpu.memory_space<vmem>>, %arg5: memref<1x384xf32, #tpu.memory_space<vmem>>, %arg6: memref<128x384xf32, #tpu.memory_space<vmem>>, %arg7: memref<1x384xf32, #tpu.memory_space<vmem>>, %arg8: memref<128x128xf32, #tpu.memory_space<vmem>>, %arg9: memref<1x128xf32, #tpu.memory_space<vmem>>, %arg10: memref<6x128xf32, #tpu.memory_space<vmem>>, %arg11: memref<1x128xf32, #tpu.memory_space<vmem>>, %arg12: memref<6x128xf32, #tpu.memory_space<vmem>>, %arg13: memref<6x384xf32, #tpu.memory_space<vmem>>, %arg14: memref<6x128xf32, #tpu.memory_space<vmem>>) attributes {dimension_semantics = [#tpu.dimension_semantics<arbitrary>], iteration_bounds = array<i64: 1>, scalar_prefetch = 1 : i64, scratch_operands = 3 : i64, tpu.core_type = #tpu.core_type<tc>, window_params = [{pipeline_mode = #tpu.pipeline_mode<synchronous>, transform_indices = @transform_0, window_bounds = array<i64: 1, 128>}, {pipeline_mode = #tpu.pipeline_mode<synchronous>, transform_indices = @transform_1, window_bounds = array<i64: 40, 128>}, {pipeline_mode = #tpu.pipeline_mode<synchronous>, transform_indices = @transform_2, window_bounds = array<i64: 128, 384>}, {pipeline_mode = #tpu.pipeline_mode<synchronous>, transform_indices = @transform_3, window_bounds = array<i64: 1, 384>}, {pipeline_mode = #tpu.pipeline_mode<synchronous>, transform_indices = @transform_4, window_bounds = array<i64: 128, 384>}, {pipeline_mode = #tpu.pipeline_mode<synchronous>, transform_indices = @transform_5, window_bounds = array<i64: 1, 384>}, {pipeline_mode = #tpu.pipeline_mode<synchronous>, transform_indices = @transform_6, window_bounds = array<i64: 128, 128>}, {pipeline_mode = #tpu.pipeline_mode<synchronous>, transform_indices = @transform_7, window_bounds = array<i64: 1, 128>}, {pipeline_mode = #tpu.pipeline_mode<synchronous>, transform_indices = @transform_8, window_bounds = array<i64: 6, 128>}, {pipeline_mode = #tpu.pipeline_mode<synchronous>, transform_indices = @transform_9, window_bounds = array<i64: 1, 128>}]} {
    %c0_i32 = arith.constant 0 : i32
    %0 = arith.index_cast %c0_i32 : i32 to index
    %1 = memref.load %arg1[%0] : memref<6xi32, #tpu.memory_space<smem>>
    %2 = arith.index_cast %1 : i32 to index
    %c0 = arith.constant 0 : index
    %3 = vector.load %arg3[%2, %c0] : memref<40x128xf32, #tpu.memory_space<vmem>>, vector<1x128xf32>
    %4 = arith.index_cast %c0_i32 : i32 to index
    %c0_0 = arith.constant 0 : index
    %5 = vector.load %arg12[%4, %c0_0] : memref<6x128xf32, #tpu.memory_space<vmem>>, vector<1x128xf32>
    tpu.vector_store %arg12[%4, %c0_0], %3 {strides = array<i32>} : memref<6x128xf32, #tpu.memory_space<vmem>>, vector<1x128xf32>,
    %c1_i32 = arith.constant 1 : i32
    %6 = arith.index_cast %c1_i32 : i32 to index
    %7 = memref.load %arg1[%6] : memref<6xi32, #tpu.memory_space<smem>>
    %8 = arith.index_cast %7 : i32 to index
    %c0_1 = arith.constant 0 : index
    %9 = vector.load %arg3[%8, %c0_1] : memref<40x128xf32, #tpu.memory_space<vmem>>, vector<1x128xf32>
    %10 = arith.index_cast %c1_i32 : i32 to index
    %c0_2 = arith.constant 0 : index
    %11 = vector.load %arg12[%10, %c0_2] : memref<6x128xf32, #tpu.memory_space<vmem>>, vector<1x128xf32>
    tpu.vector_store %arg12[%10, %c0_2], %9 {strides = array<i32>} : memref<6x128xf32, #tpu.memory_space<vmem>>, vector<1x128xf32>,
    %c2_i32 = arith.constant 2 : i32
    %12 = arith.index_cast %c2_i32 : i32 to index
    %13 = memref.load %arg1[%12] : memref<6xi32, #tpu.memory_space<smem>>
    %14 = arith.index_cast %13 : i32 to index
    %c0_3 = arith.constant 0 : index
    %15 = vector.load %arg3[%14, %c0_3] : memref<40x128xf32, #tpu.memory_space<vmem>>, vector<1x128xf32>
    %16 = arith.index_cast %c2_i32 : i32 to index
    %c0_4 = arith.constant 0 : index
    %17 = vector.load %arg12[%16, %c0_4] : memref<6x128xf32, #tpu.memory_space<vmem>>, vector<1x128xf32>
    tpu.vector_store %arg12[%16, %c0_4], %15 {strides = array<i32>} : memref<6x128xf32, #tpu.memory_space<vmem>>, vector<1x128xf32>,
    %c3_i32 = arith.constant 3 : i32
    %18 = arith.index_cast %c3_i32 : i32 to index
    %19 = memref.load %arg1[%18] : memref<6xi32, #tpu.memory_space<smem>>
    %20 = arith.index_cast %19 : i32 to index
    %c0_5 = arith.constant 0 : index
    %21 = vector.load %arg3[%20, %c0_5] : memref<40x128xf32, #tpu.memory_space<vmem>>, vector<1x128xf32>
    %22 = arith.index_cast %c3_i32 : i32 to index
    %c0_6 = arith.constant 0 : index
    %23 = vector.load %arg12[%22, %c0_6] : memref<6x128xf32, #tpu.memory_space<vmem>>, vector<1x128xf32>
    tpu.vector_store %arg12[%22, %c0_6], %21 {strides = array<i32>} : memref<6x128xf32, #tpu.memory_space<vmem>>, vector<1x128xf32>,
    %c4_i32 = arith.constant 4 : i32
    %24 = arith.index_cast %c4_i32 : i32 to index
    %25 = memref.load %arg1[%24] : memref<6xi32, #tpu.memory_space<smem>>
    %26 = arith.index_cast %25 : i32 to index
    %c0_7 = arith.constant 0 : index
    %27 = vector.load %arg3[%26, %c0_7] : memref<40x128xf32, #tpu.memory_space<vmem>>, vector<1x128xf32>
    %28 = arith.index_cast %c4_i32 : i32 to index
    %c0_8 = arith.constant 0 : index
    %29 = vector.load %arg12[%28, %c0_8] : memref<6x128xf32, #tpu.memory_space<vmem>>, vector<1x128xf32>
    tpu.vector_store %arg12[%28, %c0_8], %27 {strides = array<i32>} : memref<6x128xf32, #tpu.memory_space<vmem>>, vector<1x128xf32>,
    %c5_i32 = arith.constant 5 : i32
    %30 = arith.index_cast %c5_i32 : i32 to index
    %31 = memref.load %arg1[%30] : memref<6xi32, #tpu.memory_space<smem>>
    %32 = arith.index_cast %31 : i32 to index
    %c0_9 = arith.constant 0 : index
    %33 = vector.load %arg3[%32, %c0_9] : memref<40x128xf32, #tpu.memory_space<vmem>>, vector<1x128xf32>
    %34 = arith.index_cast %c5_i32 : i32 to index
    %c0_10 = arith.constant 0 : index
    %35 = vector.load %arg12[%34, %c0_10] : memref<6x128xf32, #tpu.memory_space<vmem>>, vector<1x128xf32>
    tpu.vector_store %arg12[%34, %c0_10], %33 {strides = array<i32>} : memref<6x128xf32, #tpu.memory_space<vmem>>, vector<1x128xf32>,
    %c6_i32 = arith.constant 6 : i32
    %c0_11 = arith.constant 0 : index
    %c0_12 = arith.constant 0 : index
    %36 = vector.load %arg12[%c0_11, %c0_12] : memref<6x128xf32, #tpu.memory_space<vmem>>, vector<6x128xf32>
    %cst = arith.constant 0.000000e+00 : f32
    %37 = vector.broadcast %cst : f32 to vector<6x128xf32>
    %38 = arith.maximumf %36, %37 : vector<6x128xf32>
    %c0_13 = arith.constant 0 : index
    %c0_14 = arith.constant 0 : index
    %39 = vector.load %arg4[%c0_13, %c0_14] : memref<128x384xf32, #tpu.memory_space<vmem>>, vector<128x384xf32>
    %cst_15 = arith.constant dense<0.000000e+00> : vector<6x384xf32>
    %40 = tpu.matmul %38, %39, %cst_15 {dimension_numbers = #tpu.dot_dimension_numbers<[1], [0], [0], [1], [0, 0, 1, 1], [], []>} : vector<6x128xf32>, vector<128x384xf32>, vector<6x384xf32> -> vector<6x384xf32>
    %c0_16 = arith.constant 0 : index
    %c0_17 = arith.constant 0 : index
    %41 = vector.load %arg5[%c0_16, %c0_17] : memref<1x384xf32, #tpu.memory_space<vmem>>, vector<1x384xf32>
    %42 = vector.broadcast %41 : vector<1x384xf32> to vector<6x384xf32>
    %43 = arith.addf %40, %42 : vector<6x384xf32>
    %c0_18 = arith.constant 0 : index
    %c0_19 = arith.constant 0 : index
    %44 = vector.load %arg13[%c0_18, %c0_19] : memref<6x384xf32, #tpu.memory_space<vmem>>, vector<6x384xf32>
    tpu.vector_store %arg13[%c0_18, %c0_19], %43 {strides = array<i32>} : memref<6x384xf32, #tpu.memory_space<vmem>>, vector<6x384xf32>,
    %c0_20 = arith.constant 0 : index
    %c0_21 = arith.constant 0 : index
    %45 = vector.load %arg2[%c0_20, %c0_21] : memref<1x128xf32, #tpu.memory_space<vmem>>, vector<1x128xf32>
    %c0_i32_22 = arith.constant 0 : i32
    %46 = arith.index_cast %c0_i32_22 : i32 to index
    %c0_23 = arith.constant 0 : index
    %47 = vector.load %arg13[%46, %c0_23] : memref<6x384xf32, #tpu.memory_space<vmem>>, vector<1x384xf32>
    %c0_24 = arith.constant 0 : index
    %c0_25 = arith.constant 0 : index
    %48 = vector.load %arg6[%c0_24, %c0_25] : memref<128x384xf32, #tpu.memory_space<vmem>>, vector<128x384xf32>
    %cst_26 = arith.constant dense<0.000000e+00> : vector<1x384xf32>
    %49 = tpu.matmul %45, %48, %cst_26 {dimension_numbers = #tpu.dot_dimension_numbers<[1], [0], [0], [1], [0, 0, 1, 1], [], []>} : vector<1x128xf32>, vector<128x384xf32>, vector<1x384xf32> -> vector<1x384xf32>
    %c0_27 = arith.constant 0 : index
    %c0_28 = arith.constant 0 : index
    %50 = vector.load %arg7[%c0_27, %c0_28] : memref<1x384xf32, #tpu.memory_space<vmem>>, vector<1x384xf32>
    %51 = arith.addf %49, %50 : vector<1x384xf32>
    %52 = vector.extract_strided_slice %47 {offsets = [0, 0], sizes = [1, 128], strides = [1, 1]} : vector<1x384xf32> to vector<1x128xf32>
    %53 = vector.extract_strided_slice %51 {offsets = [0, 0], sizes = [1, 128], strides = [1, 1]} : vector<1x384xf32> to vector<1x128xf32>
    %54 = arith.addf %52, %53 : vector<1x128xf32>
    %55 = arith.negf %54 : vector<1x128xf32>
    %56 = math.exp %55 : vector<1x128xf32>
    %cst_29 = arith.constant 1.000000e+00 : f32
    %57 = vector.broadcast %cst_29 : f32 to vector<1x128xf32>
    %58 = arith.addf %57, %56 : vector<1x128xf32>
    %59 = arith.divf %57, %58 : vector<1x128xf32>
    %60 = vector.extract_strided_slice %47 {offsets = [0, 128], sizes = [1, 128], strides = [1, 1]} : vector<1x384xf32> to vector<1x128xf32>
    %61 = vector.extract_strided_slice %51 {offsets = [0, 128], sizes = [1, 128], strides = [1, 1]} : vector<1x384xf32> to vector<1x128xf32>
    %62 = arith.addf %60, %61 : vector<1x128xf32>
    %63 = arith.negf %62 : vector<1x128xf32>
    %64 = math.exp %63 : vector<1x128xf32>
    %cst_30 = arith.constant 1.000000e+00 : f32
    %65 = vector.broadcast %cst_30 : f32 to vector<1x128xf32>
    %66 = arith.addf %65, %64 : vector<1x128xf32>
    %67 = arith.divf %65, %66 : vector<1x128xf32>
    %68 = vector.extract_strided_slice %47 {offsets = [0, 256], sizes = [1, 128], strides = [1, 1]} : vector<1x384xf32> to vector<1x128xf32>
    %69 = vector.extract_strided_slice %51 {offsets = [0, 256], sizes = [1, 128], strides = [1, 1]} : vector<1x384xf32> to vector<1x128xf32>
    %70 = arith.mulf %59, %69 : vector<1x128xf32>
    %71 = arith.addf %68, %70 : vector<1x128xf32>
    %72 = math.tanh %71 : vector<1x128xf32>
    %cst_31 = arith.constant 1.000000e+00 : f32
    %73 = vector.broadcast %cst_31 : f32 to vector<1x128xf32>
    %74 = arith.subf %73, %67 : vector<1x128xf32>
    %75 = arith.mulf %74, %72 : vector<1x128xf32>
    %76 = arith.mulf %67, %45 : vector<1x128xf32>
    %77 = arith.addf %75, %76 : vector<1x128xf32>
    %78 = arith.index_cast %c0_i32_22 : i32 to index
    %c0_32 = arith.constant 0 : index
    %79 = vector.load %arg14[%78, %c0_32] : memref<6x128xf32, #tpu.memory_space<vmem>>, vector<1x128xf32>
    tpu.vector_store %arg14[%78, %c0_32], %77 {strides = array<i32>} : memref<6x128xf32, #tpu.memory_space<vmem>>, vector<1x128xf32>,
    %c1_i32_33 = arith.constant 1 : i32
    %80 = arith.index_cast %c1_i32_33 : i32 to index
    %c0_34 = arith.constant 0 : index
    %81 = vector.load %arg13[%80, %c0_34] : memref<6x384xf32, #tpu.memory_space<vmem>>, vector<1x384xf32>
    %c0_35 = arith.constant 0 : index
    %c0_36 = arith.constant 0 : index
    %82 = vector.load %arg6[%c0_35, %c0_36] : memref<128x384xf32, #tpu.memory_space<vmem>>, vector<128x384xf32>
    %cst_37 = arith.constant dense<0.000000e+00> : vector<1x384xf32>
    %83 = tpu.matmul %77, %82, %cst_37 {dimension_numbers = #tpu.dot_dimension_numbers<[1], [0], [0], [1], [0, 0, 1, 1], [], []>} : vector<1x128xf32>, vector<128x384xf32>, vector<1x384xf32> -> vector<1x384xf32>
    %c0_38 = arith.constant 0 : index
    %c0_39 = arith.constant 0 : index
    %84 = vector.load %arg7[%c0_38, %c0_39] : memref<1x384xf32, #tpu.memory_space<vmem>>, vector<1x384xf32>
    %85 = arith.addf %83, %84 : vector<1x384xf32>
    %86 = vector.extract_strided_slice %81 {offsets = [0, 0], sizes = [1, 128], strides = [1, 1]} : vector<1x384xf32> to vector<1x128xf32>
    %87 = vector.extract_strided_slice %85 {offsets = [0, 0], sizes = [1, 128], strides = [1, 1]} : vector<1x384xf32> to vector<1x128xf32>
    %88 = arith.addf %86, %87 : vector<1x128xf32>
    %89 = arith.negf %88 : vector<1x128xf32>
    %90 = math.exp %89 : vector<1x128xf32>
    %cst_40 = arith.constant 1.000000e+00 : f32
    %91 = vector.broadcast %cst_40 : f32 to vector<1x128xf32>
    %92 = arith.addf %91, %90 : vector<1x128xf32>
    %93 = arith.divf %91, %92 : vector<1x128xf32>
    %94 = vector.extract_strided_slice %81 {offsets = [0, 128], sizes = [1, 128], strides = [1, 1]} : vector<1x384xf32> to vector<1x128xf32>
    %95 = vector.extract_strided_slice %85 {offsets = [0, 128], sizes = [1, 128], strides = [1, 1]} : vector<1x384xf32> to vector<1x128xf32>
    %96 = arith.addf %94, %95 : vector<1x128xf32>
    %97 = arith.negf %96 : vector<1x128xf32>
    %98 = math.exp %97 : vector<1x128xf32>
    %cst_41 = arith.constant 1.000000e+00 : f32
    %99 = vector.broadcast %cst_41 : f32 to vector<1x128xf32>
    %100 = arith.addf %99, %98 : vector<1x128xf32>
    %101 = arith.divf %99, %100 : vector<1x128xf32>
    %102 = vector.extract_strided_slice %81 {offsets = [0, 256], sizes = [1, 128], strides = [1, 1]} : vector<1x384xf32> to vector<1x128xf32>
    %103 = vector.extract_strided_slice %85 {offsets = [0, 256], sizes = [1, 128], strides = [1, 1]} : vector<1x384xf32> to vector<1x128xf32>
    %104 = arith.mulf %93, %103 : vector<1x128xf32>
    %105 = arith.addf %102, %104 : vector<1x128xf32>
    %106 = math.tanh %105 : vector<1x128xf32>
    %cst_42 = arith.constant 1.000000e+00 : f32
    %107 = vector.broadcast %cst_42 : f32 to vector<1x128xf32>
    %108 = arith.subf %107, %101 : vector<1x128xf32>
    %109 = arith.mulf %108, %106 : vector<1x128xf32>
    %110 = arith.mulf %101, %77 : vector<1x128xf32>
    %111 = arith.addf %109, %110 : vector<1x128xf32>
    %112 = arith.index_cast %c1_i32_33 : i32 to index
    %c0_43 = arith.constant 0 : index
    %113 = vector.load %arg14[%112, %c0_43] : memref<6x128xf32, #tpu.memory_space<vmem>>, vector<1x128xf32>
    tpu.vector_store %arg14[%112, %c0_43], %111 {strides = array<i32>} : memref<6x128xf32, #tpu.memory_space<vmem>>, vector<1x128xf32>,
    %c2_i32_44 = arith.constant 2 : i32
    %114 = arith.index_cast %c2_i32_44 : i32 to index
    %c0_45 = arith.constant 0 : index
    %115 = vector.load %arg13[%114, %c0_45] : memref<6x384xf32, #tpu.memory_space<vmem>>, vector<1x384xf32>
    %c0_46 = arith.constant 0 : index
    %c0_47 = arith.constant 0 : index
    %116 = vector.load %arg6[%c0_46, %c0_47] : memref<128x384xf32, #tpu.memory_space<vmem>>, vector<128x384xf32>
    %cst_48 = arith.constant dense<0.000000e+00> : vector<1x384xf32>
    %117 = tpu.matmul %111, %116, %cst_48 {dimension_numbers = #tpu.dot_dimension_numbers<[1], [0], [0], [1], [0, 0, 1, 1], [], []>} : vector<1x128xf32>, vector<128x384xf32>, vector<1x384xf32> -> vector<1x384xf32>
    %c0_49 = arith.constant 0 : index
    %c0_50 = arith.constant 0 : index
    %118 = vector.load %arg7[%c0_49, %c0_50] : memref<1x384xf32, #tpu.memory_space<vmem>>, vector<1x384xf32>
    %119 = arith.addf %117, %118 : vector<1x384xf32>
    %120 = vector.extract_strided_slice %115 {offsets = [0, 0], sizes = [1, 128], strides = [1, 1]} : vector<1x384xf32> to vector<1x128xf32>
    %121 = vector.extract_strided_slice %119 {offsets = [0, 0], sizes = [1, 128], strides = [1, 1]} : vector<1x384xf32> to vector<1x128xf32>
    %122 = arith.addf %120, %121 : vector<1x128xf32>
    %123 = arith.negf %122 : vector<1x128xf32>
    %124 = math.exp %123 : vector<1x128xf32>
    %cst_51 = arith.constant 1.000000e+00 : f32
    %125 = vector.broadcast %cst_51 : f32 to vector<1x128xf32>
    %126 = arith.addf %125, %124 : vector<1x128xf32>
    %127 = arith.divf %125, %126 : vector<1x128xf32>
    %128 = vector.extract_strided_slice %115 {offsets = [0, 128], sizes = [1, 128], strides = [1, 1]} : vector<1x384xf32> to vector<1x128xf32>
    %129 = vector.extract_strided_slice %119 {offsets = [0, 128], sizes = [1, 128], strides = [1, 1]} : vector<1x384xf32> to vector<1x128xf32>
    %130 = arith.addf %128, %129 : vector<1x128xf32>
    %131 = arith.negf %130 : vector<1x128xf32>
    %132 = math.exp %131 : vector<1x128xf32>
    %cst_52 = arith.constant 1.000000e+00 : f32
    %133 = vector.broadcast %cst_52 : f32 to vector<1x128xf32>
    %134 = arith.addf %133, %132 : vector<1x128xf32>
    %135 = arith.divf %133, %134 : vector<1x128xf32>
    %136 = vector.extract_strided_slice %115 {offsets = [0, 256], sizes = [1, 128], strides = [1, 1]} : vector<1x384xf32> to vector<1x128xf32>
    %137 = vector.extract_strided_slice %119 {offsets = [0, 256], sizes = [1, 128], strides = [1, 1]} : vector<1x384xf32> to vector<1x128xf32>
    %138 = arith.mulf %127, %137 : vector<1x128xf32>
    %139 = arith.addf %136, %138 : vector<1x128xf32>
    %140 = math.tanh %139 : vector<1x128xf32>
    %cst_53 = arith.constant 1.000000e+00 : f32
    %141 = vector.broadcast %cst_53 : f32 to vector<1x128xf32>
    %142 = arith.subf %141, %135 : vector<1x128xf32>
    %143 = arith.mulf %142, %140 : vector<1x128xf32>
    %144 = arith.mulf %135, %111 : vector<1x128xf32>
    %145 = arith.addf %143, %144 : vector<1x128xf32>
    %146 = arith.index_cast %c2_i32_44 : i32 to index
    %c0_54 = arith.constant 0 : index
    %147 = vector.load %arg14[%146, %c0_54] : memref<6x128xf32, #tpu.memory_space<vmem>>, vector<1x128xf32>
    tpu.vector_store %arg14[%146, %c0_54], %145 {strides = array<i32>} : memref<6x128xf32, #tpu.memory_space<vmem>>, vector<1x128xf32>,
    %c3_i32_55 = arith.constant 3 : i32
    %148 = arith.index_cast %c3_i32_55 : i32 to index
    %c0_56 = arith.constant 0 : index
    %149 = vector.load %arg13[%148, %c0_56] : memref<6x384xf32, #tpu.memory_space<vmem>>, vector<1x384xf32>
    %c0_57 = arith.constant 0 : index
    %c0_58 = arith.constant 0 : index
    %150 = vector.load %arg6[%c0_57, %c0_58] : memref<128x384xf32, #tpu.memory_space<vmem>>, vector<128x384xf32>
    %cst_59 = arith.constant dense<0.000000e+00> : vector<1x384xf32>
    %151 = tpu.matmul %145, %150, %cst_59 {dimension_numbers = #tpu.dot_dimension_numbers<[1], [0], [0], [1], [0, 0, 1, 1], [], []>} : vector<1x128xf32>, vector<128x384xf32>, vector<1x384xf32> -> vector<1x384xf32>
    %c0_60 = arith.constant 0 : index
    %c0_61 = arith.constant 0 : index
    %152 = vector.load %arg7[%c0_60, %c0_61] : memref<1x384xf32, #tpu.memory_space<vmem>>, vector<1x384xf32>
    %153 = arith.addf %151, %152 : vector<1x384xf32>
    %154 = vector.extract_strided_slice %149 {offsets = [0, 0], sizes = [1, 128], strides = [1, 1]} : vector<1x384xf32> to vector<1x128xf32>
    %155 = vector.extract_strided_slice %153 {offsets = [0, 0], sizes = [1, 128], strides = [1, 1]} : vector<1x384xf32> to vector<1x128xf32>
    %156 = arith.addf %154, %155 : vector<1x128xf32>
    %157 = arith.negf %156 : vector<1x128xf32>
    %158 = math.exp %157 : vector<1x128xf32>
    %cst_62 = arith.constant 1.000000e+00 : f32
    %159 = vector.broadcast %cst_62 : f32 to vector<1x128xf32>
    %160 = arith.addf %159, %158 : vector<1x128xf32>
    %161 = arith.divf %159, %160 : vector<1x128xf32>
    %162 = vector.extract_strided_slice %149 {offsets = [0, 128], sizes = [1, 128], strides = [1, 1]} : vector<1x384xf32> to vector<1x128xf32>
    %163 = vector.extract_strided_slice %153 {offsets = [0, 128], sizes = [1, 128], strides = [1, 1]} : vector<1x384xf32> to vector<1x128xf32>
    %164 = arith.addf %162, %163 : vector<1x128xf32>
    %165 = arith.negf %164 : vector<1x128xf32>
    %166 = math.exp %165 : vector<1x128xf32>
    %cst_63 = arith.constant 1.000000e+00 : f32
    %167 = vector.broadcast %cst_63 : f32 to vector<1x128xf32>
    %168 = arith.addf %167, %166 : vector<1x128xf32>
    %169 = arith.divf %167, %168 : vector<1x128xf32>
    %170 = vector.extract_strided_slice %149 {offsets = [0, 256], sizes = [1, 128], strides = [1, 1]} : vector<1x384xf32> to vector<1x128xf32>
    %171 = vector.extract_strided_slice %153 {offsets = [0, 256], sizes = [1, 128], strides = [1, 1]} : vector<1x384xf32> to vector<1x128xf32>
    %172 = arith.mulf %161, %171 : vector<1x128xf32>
    %173 = arith.addf %170, %172 : vector<1x128xf32>
    %174 = math.tanh %173 : vector<1x128xf32>
    %cst_64 = arith.constant 1.000000e+00 : f32
    %175 = vector.broadcast %cst_64 : f32 to vector<1x128xf32>
    %176 = arith.subf %175, %169 : vector<1x128xf32>
    %177 = arith.mulf %176, %174 : vector<1x128xf32>
    %178 = arith.mulf %169, %145 : vector<1x128xf32>
    %179 = arith.addf %177, %178 : vector<1x128xf32>
    %180 = arith.index_cast %c3_i32_55 : i32 to index
    %c0_65 = arith.constant 0 : index
    %181 = vector.load %arg14[%180, %c0_65] : memref<6x128xf32, #tpu.memory_space<vmem>>, vector<1x128xf32>
    tpu.vector_store %arg14[%180, %c0_65], %179 {strides = array<i32>} : memref<6x128xf32, #tpu.memory_space<vmem>>, vector<1x128xf32>,
    %c4_i32_66 = arith.constant 4 : i32
    %182 = arith.index_cast %c4_i32_66 : i32 to index
    %c0_67 = arith.constant 0 : index
    %183 = vector.load %arg13[%182, %c0_67] : memref<6x384xf32, #tpu.memory_space<vmem>>, vector<1x384xf32>
    %c0_68 = arith.constant 0 : index
    %c0_69 = arith.constant 0 : index
    %184 = vector.load %arg6[%c0_68, %c0_69] : memref<128x384xf32, #tpu.memory_space<vmem>>, vector<128x384xf32>
    %cst_70 = arith.constant dense<0.000000e+00> : vector<1x384xf32>
    %185 = tpu.matmul %179, %184, %cst_70 {dimension_numbers = #tpu.dot_dimension_numbers<[1], [0], [0], [1], [0, 0, 1, 1], [], []>} : vector<1x128xf32>, vector<128x384xf32>, vector<1x384xf32> -> vector<1x384xf32>
    %c0_71 = arith.constant 0 : index
    %c0_72 = arith.constant 0 : index
    %186 = vector.load %arg7[%c0_71, %c0_72] : memref<1x384xf32, #tpu.memory_space<vmem>>, vector<1x384xf32>
    %187 = arith.addf %185, %186 : vector<1x384xf32>
    %188 = vector.extract_strided_slice %183 {offsets = [0, 0], sizes = [1, 128], strides = [1, 1]} : vector<1x384xf32> to vector<1x128xf32>
    %189 = vector.extract_strided_slice %187 {offsets = [0, 0], sizes = [1, 128], strides = [1, 1]} : vector<1x384xf32> to vector<1x128xf32>
    %190 = arith.addf %188, %189 : vector<1x128xf32>
    %191 = arith.negf %190 : vector<1x128xf32>
    %192 = math.exp %191 : vector<1x128xf32>
    %cst_73 = arith.constant 1.000000e+00 : f32
    %193 = vector.broadcast %cst_73 : f32 to vector<1x128xf32>
    %194 = arith.addf %193, %192 : vector<1x128xf32>
    %195 = arith.divf %193, %194 : vector<1x128xf32>
    %196 = vector.extract_strided_slice %183 {offsets = [0, 128], sizes = [1, 128], strides = [1, 1]} : vector<1x384xf32> to vector<1x128xf32>
    %197 = vector.extract_strided_slice %187 {offsets = [0, 128], sizes = [1, 128], strides = [1, 1]} : vector<1x384xf32> to vector<1x128xf32>
    %198 = arith.addf %196, %197 : vector<1x128xf32>
    %199 = arith.negf %198 : vector<1x128xf32>
    %200 = math.exp %199 : vector<1x128xf32>
    %cst_74 = arith.constant 1.000000e+00 : f32
    %201 = vector.broadcast %cst_74 : f32 to vector<1x128xf32>
    %202 = arith.addf %201, %200 : vector<1x128xf32>
    %203 = arith.divf %201, %202 : vector<1x128xf32>
    %204 = vector.extract_strided_slice %183 {offsets = [0, 256], sizes = [1, 128], strides = [1, 1]} : vector<1x384xf32> to vector<1x128xf32>
    %205 = vector.extract_strided_slice %187 {offsets = [0, 256], sizes = [1, 128], strides = [1, 1]} : vector<1x384xf32> to vector<1x128xf32>
    %206 = arith.mulf %195, %205 : vector<1x128xf32>
    %207 = arith.addf %204, %206 : vector<1x128xf32>
    %208 = math.tanh %207 : vector<1x128xf32>
    %cst_75 = arith.constant 1.000000e+00 : f32
    %209 = vector.broadcast %cst_75 : f32 to vector<1x128xf32>
    %210 = arith.subf %209, %203 : vector<1x128xf32>
    %211 = arith.mulf %210, %208 : vector<1x128xf32>
    %212 = arith.mulf %203, %179 : vector<1x128xf32>
    %213 = arith.addf %211, %212 : vector<1x128xf32>
    %214 = arith.index_cast %c4_i32_66 : i32 to index
    %c0_76 = arith.constant 0 : index
    %215 = vector.load %arg14[%214, %c0_76] : memref<6x128xf32, #tpu.memory_space<vmem>>, vector<1x128xf32>
    tpu.vector_store %arg14[%214, %c0_76], %213 {strides = array<i32>} : memref<6x128xf32, #tpu.memory_space<vmem>>, vector<1x128xf32>,
    %c5_i32_77 = arith.constant 5 : i32
    %216 = arith.index_cast %c5_i32_77 : i32 to index
    %c0_78 = arith.constant 0 : index
    %217 = vector.load %arg13[%216, %c0_78] : memref<6x384xf32, #tpu.memory_space<vmem>>, vector<1x384xf32>
    %c0_79 = arith.constant 0 : index
    %c0_80 = arith.constant 0 : index
    %218 = vector.load %arg6[%c0_79, %c0_80] : memref<128x384xf32, #tpu.memory_space<vmem>>, vector<128x384xf32>
    %cst_81 = arith.constant dense<0.000000e+00> : vector<1x384xf32>
    %219 = tpu.matmul %213, %218, %cst_81 {dimension_numbers = #tpu.dot_dimension_numbers<[1], [0], [0], [1], [0, 0, 1, 1], [], []>} : vector<1x128xf32>, vector<128x384xf32>, vector<1x384xf32> -> vector<1x384xf32>
    %c0_82 = arith.constant 0 : index
    %c0_83 = arith.constant 0 : index
    %220 = vector.load %arg7[%c0_82, %c0_83] : memref<1x384xf32, #tpu.memory_space<vmem>>, vector<1x384xf32>
    %221 = arith.addf %219, %220 : vector<1x384xf32>
    %222 = vector.extract_strided_slice %217 {offsets = [0, 0], sizes = [1, 128], strides = [1, 1]} : vector<1x384xf32> to vector<1x128xf32>
    %223 = vector.extract_strided_slice %221 {offsets = [0, 0], sizes = [1, 128], strides = [1, 1]} : vector<1x384xf32> to vector<1x128xf32>
    %224 = arith.addf %222, %223 : vector<1x128xf32>
    %225 = arith.negf %224 : vector<1x128xf32>
    %226 = math.exp %225 : vector<1x128xf32>
    %cst_84 = arith.constant 1.000000e+00 : f32
    %227 = vector.broadcast %cst_84 : f32 to vector<1x128xf32>
    %228 = arith.addf %227, %226 : vector<1x128xf32>
    %229 = arith.divf %227, %228 : vector<1x128xf32>
    %230 = vector.extract_strided_slice %217 {offsets = [0, 128], sizes = [1, 128], strides = [1, 1]} : vector<1x384xf32> to vector<1x128xf32>
    %231 = vector.extract_strided_slice %221 {offsets = [0, 128], sizes = [1, 128], strides = [1, 1]} : vector<1x384xf32> to vector<1x128xf32>
    %232 = arith.addf %230, %231 : vector<1x128xf32>
    %233 = arith.negf %232 : vector<1x128xf32>
    %234 = math.exp %233 : vector<1x128xf32>
    %cst_85 = arith.constant 1.000000e+00 : f32
    %235 = vector.broadcast %cst_85 : f32 to vector<1x128xf32>
    %236 = arith.addf %235, %234 : vector<1x128xf32>
    %237 = arith.divf %235, %236 : vector<1x128xf32>
    %238 = vector.extract_strided_slice %217 {offsets = [0, 256], sizes = [1, 128], strides = [1, 1]} : vector<1x384xf32> to vector<1x128xf32>
    %239 = vector.extract_strided_slice %221 {offsets = [0, 256], sizes = [1, 128], strides = [1, 1]} : vector<1x384xf32> to vector<1x128xf32>
    %240 = arith.mulf %229, %239 : vector<1x128xf32>
    %241 = arith.addf %238, %240 : vector<1x128xf32>
    %242 = math.tanh %241 : vector<1x128xf32>
    %cst_86 = arith.constant 1.000000e+00 : f32
    %243 = vector.broadcast %cst_86 : f32 to vector<1x128xf32>
    %244 = arith.subf %243, %237 : vector<1x128xf32>
    %245 = arith.mulf %244, %242 : vector<1x128xf32>
    %246 = arith.mulf %237, %213 : vector<1x128xf32>
    %247 = arith.addf %245, %246 : vector<1x128xf32>
    %248 = arith.index_cast %c5_i32_77 : i32 to index
    %c0_87 = arith.constant 0 : index
    %249 = vector.load %arg14[%248, %c0_87] : memref<6x128xf32, #tpu.memory_space<vmem>>, vector<1x128xf32>
    tpu.vector_store %arg14[%248, %c0_87], %247 {strides = array<i32>} : memref<6x128xf32, #tpu.memory_space<vmem>>, vector<1x128xf32>,
    %c6_i32_88 = arith.constant 6 : i32
    %c0_89 = arith.constant 0 : index
    %c0_90 = arith.constant 0 : index
    %250 = vector.load %arg11[%c0_89, %c0_90] : memref<1x128xf32, #tpu.memory_space<vmem>>, vector<1x128xf32>
    tpu.vector_store %arg11[%c0_89, %c0_90], %247 {strides = array<i32>} : memref<1x128xf32, #tpu.memory_space<vmem>>, vector<1x128xf32>,
    %c0_91 = arith.constant 0 : index
    %c0_92 = arith.constant 0 : index
    %251 = vector.load %arg14[%c0_91, %c0_92] : memref<6x128xf32, #tpu.memory_space<vmem>>, vector<6x128xf32>
    %c0_93 = arith.constant 0 : index
    %c0_94 = arith.constant 0 : index
    %252 = vector.load %arg8[%c0_93, %c0_94] : memref<128x128xf32, #tpu.memory_space<vmem>>, vector<128x128xf32>
    %cst_95 = arith.constant dense<0.000000e+00> : vector<6x128xf32>
    %253 = tpu.matmul %251, %252, %cst_95 {dimension_numbers = #tpu.dot_dimension_numbers<[1], [0], [0], [1], [0, 0, 1, 1], [], []>} : vector<6x128xf32>, vector<128x128xf32>, vector<6x128xf32> -> vector<6x128xf32>
    %c0_96 = arith.constant 0 : index
    %c0_97 = arith.constant 0 : index
    %254 = vector.load %arg9[%c0_96, %c0_97] : memref<1x128xf32, #tpu.memory_space<vmem>>, vector<1x128xf32>
    %255 = vector.broadcast %254 : vector<1x128xf32> to vector<6x128xf32>
    %256 = arith.addf %253, %255 : vector<6x128xf32>
    %c0_98 = arith.constant 0 : index
    %c0_99 = arith.constant 0 : index
    %257 = vector.load %arg10[%c0_98, %c0_99] : memref<6x128xf32, #tpu.memory_space<vmem>>, vector<6x128xf32>
    tpu.vector_store %arg10[%c0_98, %c0_99], %256 {strides = array<i32>} : memref<6x128xf32, #tpu.memory_space<vmem>>, vector<6x128xf32>,
    return
  }
  func.func @transform_0(%arg0: i32, %arg1: memref<6xi32, #tpu.memory_space<smem>>) -> (i32, i32) {
    %c0_i32 = arith.constant 0 : i32
    %c0_i32_0 = arith.constant 0 : i32
    %c0_i32_1 = arith.constant 0 : i32
    return %c0_i32, %c0_i32_0 : i32, i32
  }
  func.func @transform_1(%arg0: i32, %arg1: memref<6xi32, #tpu.memory_space<smem>>) -> (i32, i32) {
    %c0_i32 = arith.constant 0 : i32
    %c0_i32_0 = arith.constant 0 : i32
    %c0_i32_1 = arith.constant 0 : i32
    return %c0_i32, %c0_i32_0 : i32, i32
  }
  func.func @transform_2(%arg0: i32, %arg1: memref<6xi32, #tpu.memory_space<smem>>) -> (i32, i32) {
    %c0_i32 = arith.constant 0 : i32
    %c0_i32_0 = arith.constant 0 : i32
    %c0_i32_1 = arith.constant 0 : i32
    return %c0_i32, %c0_i32_0 : i32, i32
  }
  func.func @transform_3(%arg0: i32, %arg1: memref<6xi32, #tpu.memory_space<smem>>) -> (i32, i32) {
    %c0_i32 = arith.constant 0 : i32
    %c0_i32_0 = arith.constant 0 : i32
    %c0_i32_1 = arith.constant 0 : i32
    return %c0_i32, %c0_i32_0 : i32, i32
  }
  func.func @transform_4(%arg0: i32, %arg1: memref<6xi32, #tpu.memory_space<smem>>) -> (i32, i32) {
    %c0_i32 = arith.constant 0 : i32
    %c0_i32_0 = arith.constant 0 : i32
    %c0_i32_1 = arith.constant 0 : i32
    return %c0_i32, %c0_i32_0 : i32, i32
  }
  func.func @transform_5(%arg0: i32, %arg1: memref<6xi32, #tpu.memory_space<smem>>) -> (i32, i32) {
    %c0_i32 = arith.constant 0 : i32
    %c0_i32_0 = arith.constant 0 : i32
    %c0_i32_1 = arith.constant 0 : i32
    return %c0_i32, %c0_i32_0 : i32, i32
  }
  func.func @transform_6(%arg0: i32, %arg1: memref<6xi32, #tpu.memory_space<smem>>) -> (i32, i32) {
    %c0_i32 = arith.constant 0 : i32
    %c0_i32_0 = arith.constant 0 : i32
    %c0_i32_1 = arith.constant 0 : i32
    return %c0_i32, %c0_i32_0 : i32, i32
  }
  func.func @transform_7(%arg0: i32, %arg1: memref<6xi32, #tpu.memory_space<smem>>) -> (i32, i32) {
    %c0_i32 = arith.constant 0 : i32
    %c0_i32_0 = arith.constant 0 : i32
    %c0_i32_1 = arith.constant 0 : i32
    return %c0_i32, %c0_i32_0 : i32, i32
  }
  func.func @transform_8(%arg0: i32, %arg1: memref<6xi32, #tpu.memory_space<smem>>) -> (i32, i32) {
    %c0_i32 = arith.constant 0 : i32
    %c0_i32_0 = arith.constant 0 : i32
    %c0_i32_1 = arith.constant 0 : i32
    return %c0_i32, %c0_i32_0 : i32, i32
  }
  func.func @transform_9(%arg0: i32, %arg1: memref<6xi32, #tpu.memory_space<smem>>) -> (i32, i32) {
    %c0_i32 = arith.constant 0 : i32
    %c0_i32_0 = arith.constant 0 : i32
    %c0_i32_1 = arith.constant 0 : i32
    return %c0_i32, %c0_i32_0 : i32, i32
  }
}

</mosaic_0001>

<bundles_post_ra>
// kernel: tpu_custom_call.1
= control target key start
LH: loop header
LB: loop body
LE: loop exit
PB: predicated region body
PF: predicated region fallthrough
CT: control target
= control target key end

     0   :  { %s1697_s16 = smov [#allocation6]   ;;  %s2229_s0 = inlined_call_operand.hbm [shape: s32[6], index: 0, kind: input, shape index: {}]   ;;  %s2230_s1 = inlined_call_operand.hbm [shape: f32[1,128], index: 1, kind: input, shape index: {}]   ;;  %s2231_s2 = inlined_call_operand.hbm [shape: f32[40,128], index: 2, kind: input, shape index: {}]   ;;  %s2232_s3 = inlined_call_operand.hbm [shape: f32[128,384], index: 3, kind: input, shape index: {}]   ;;  %s2233_s4 = inlined_call_operand.vmem [shape: f32[1,384], index: 4, kind: input, shape index: {}]   ;;  %s2234_s5 = inlined_call_operand.hbm [shape: f32[128,384], index: 5, kind: input, shape index: {}]   ;;  %s2235_s6 = inlined_call_operand.hbm [shape: f32[1,384], index: 6, kind: input, shape index: {}]   ;;  %s2236_s7 = inlined_call_operand.hbm [shape: f32[128,128], index: 7, kind: input, shape index: {}]   ;;  %s2237_s8 = inlined_call_operand.vmem [shape: f32[1,128], index: 8, kind: input, shape index: {}]   ;;  %s2238_s9 = inlined_call_operand.hbm [shape: f32[6,128], index: 9, kind: output, shape index: {0}]   ;;  %s2239_s10 = inlined_call_operand.hbm [shape: f32[1,128], index: 10, kind: output, shape index: {1}]  }
   0x1   :  { %s17_s15 = sshll.u32 %s2229_s0, 4  ;;  %s18_s15 = int_to_ptr.hbm [resolvable:$true] %s17_s15 }
   0x2   :  { %20 = dma.hbm_to_smem %s18_s15, 16, %s1697_s16, [#allocation5] }
   0x3   :  { %1683 = dma.done.wait [#allocation5], 16 }
   0x4   :  { %1684 = vsyncadd [#allocation5], 4294967280 }
   0x5   :  { %23 = sfence }
   0x6   :  { %24 = vsyncpa [#allocation8], 0 }
   0x7   :  { %25 = vsyncpa [#allocation11], 0 }
   0x8   :  { %26 = vsyncpa [#allocation14], 0 }
   0x9   :  { %27 = vsyncpa [#allocation17], 0 }
   0xa   :  { %28 = vsyncpa [#allocation9], 0  ;;  %s45_s19 = sshll.u32 %s2231_s2, 4  ;;  %s46_s19 = int_to_ptr.hbm [resolvable:$true] %s45_s19 }
   0xb   :  { %29 = vsyncpa [#allocation20], 0  ;;  %s1698_s20 = smov [#allocation10]   ;;  %s1699_s0 = smov 128  }
   0xc   :  { %s47_s21 = sshll.u32 %s1698_s20, 4  ;;  %s1700_s22 = smov 8   ;;  %s48_s21 = int_to_ptr.vmem [resolvable:$true] %s47_s21 }
   0xd   :  { %53 = dma.hbm_to_vmem [thread:$0]  %s46_s19, 640, %s48_s21, [#allocation11], %s1699_s0, %s1699_s0, %s1700_s22  }
   0xe   :  { %s73_s25 = sshll.u32 %s2234_s5, 4  ;;  %s1701_s26 = smov [#allocation13]   ;;  %s74_s25 = int_to_ptr.hbm [resolvable:$true] %s73_s25 }
   0xf   :  { %s75_s27 = sshll.u32 %s1701_s26, 4  ;;  %s35_s29 = sshll.u32 %s2230_s1, 4  ;;  %s76_s27 = int_to_ptr.vmem [resolvable:$true] %s75_s27  ;;  %s36_s29 = int_to_ptr.hbm [resolvable:$true] %s35_s29 }
  0x10   :  { %s1702_s30 = smov 384   ;;  %s1703_s11 = smov 24  }
  0x11   :  { %81 = dma.hbm_to_vmem [thread:$0]  %s74_s25, 6144, %s76_s27, [#allocation14], %s1702_s30, %s1702_s30, %s1703_s11  }
  0x12   :  { %s58_s14 = sshll.u32 %s2232_s3, 4  ;;  %s1704_s15 = smov [#allocation7]   ;;  %s59_s14 = int_to_ptr.hbm [resolvable:$true] %s58_s14 }
  0x13   :  { %s37_s16 = sshll.u32 %s1704_s15, 4  ;;  %s1705_s5 = smov [#allocation12]   ;;  %s38_s16 = int_to_ptr.vmem [resolvable:$true] %s37_s16 }
  0x14   :  { %40 = dma.hbm_to_vmem [thread:$0]  %s36_s29, 16, %s38_s16, [#allocation8]  }
  0x15   :  { %s60_s17 = sshll.u32 %s1705_s5, 4  ;;  %s87_s1 = sshll.u32 %s2235_s6, 4  ;;  %s61_s17 = int_to_ptr.vmem [resolvable:$true] %s60_s17  ;;  %s88_s1 = int_to_ptr.hbm [resolvable:$true] %s87_s1 }
  0x16   :  { %66 = dma.hbm_to_vmem [thread:$0]  %s59_s14, 6144, %s61_s17, [#allocation11], %s1702_s30, %s1702_s30, %s1703_s11  }
  0x17   :  { %s97_s23 = sshll.u32 %s2236_s7, 4  ;;  %s1706_s24 = smov [#allocation15]   ;;  %s98_s23 = int_to_ptr.hbm [resolvable:$true] %s97_s23 }
  0x18   :  { %s89_s3 = sshll.u32 %s1706_s24, 4  ;;  %s1707_s25 = smov [#allocation16]   ;;  %s90_s3 = int_to_ptr.vmem [resolvable:$true] %s89_s3 }
  0x19   :  { %92 = dma.hbm_to_vmem [thread:$0]  %s88_s1, 48, %s90_s3, [#allocation14]  }
  0x1a   :  { %s99_s26 = sshll.u32 %s1707_s25, 4  ;;  %s100_s26 = int_to_ptr.vmem [resolvable:$true] %s99_s26 }
  0x1b   :  { %105 = dma.hbm_to_vmem [thread:$0]  %s98_s23, 2048, %s100_s26, [#allocation17], %s1699_s0, %s1699_s0, %s1700_s22  }
  0x1c   :  { %1685 = dma.done.wait [#allocation8], 16  }
  0x1d   :  { %1686 = vsyncadd [#allocation8], 4294967280 }
  0x1e   :  { %1687 = dma.done.wait [#allocation11], 6784  }
  0x1f   :  { %1688 = vsyncadd [#allocation11], 4294960512 }
  0x20   :  { %1689 = dma.done.wait [#allocation14], 6192  }
  0x21   :  { %1690 = vsyncadd [#allocation14], 4294961104 }
  0x22   :  { %1691 = dma.done.wait [#allocation17], 2048  }
  0x23   :  { %1692 = vsyncadd [#allocation17], 4294965248  ;;  %v203_v0 = vld [vmem:[#allocation12 + $0x168] sm:$0xff]  ;;  %v205_v1 = vld [vmem:[#allocation12 + $0x178] sm:$0xff]  ;;  %s1796_s6 = sld [smem:[#allocation6]]  ;;  %s1364_s18 = sshll.u32 %s2239_s10, 4  ;;  %s1365_s18 = int_to_ptr.hbm [resolvable:$true] %s1364_s18 }
  0x24   :  { %v200_v2 = vld [vmem:[#allocation12 + $0x150] sm:$0xff]  ;;  %214 = vmatpush.msra.mxu0 %v203_v0  ;;  %254 = vmatpush.msra.mxu2 %v205_v1  ;;  %v202_v3 = vld [vmem:[#allocation12 + $0x160] sm:$0xff]  ;;  %v197_v4 = vld [vmem:[#allocation12 + $0x138] sm:$0xff]  ;;  %s1799_s7 = sld [smem:[#allocation6 + $0x1]]  ;;  %s1709_s20 = smov [#allocation18]  }
  0x25   :  { %v199_v5 = vld [vmem:[#allocation12 + $0x148] sm:$0xff]  ;;  %v204_v6 = vld [vmem:[#allocation12 + $0x170] sm:$0xff]  ;;  %v201_v7 = vld [vmem:[#allocation12 + $0x158] sm:$0xff]  ;;  %s1803_s0 = sld [smem:[#allocation6 + $0x2]]  ;;  %s1351_s21 = sshll.u32 %s1709_s20, 4  ;;  %s1352_s21 = int_to_ptr.vmem [resolvable:$true] %s1351_s21 }
  0x26   :  { %215 = vmatpush.msra.mxu0 %v200_v2  ;;  %255 = vmatpush.msra.mxu2 %v202_v3  ;;  %v194_v8 = vld [vmem:[#allocation12 + $0x120] sm:$0xff]  ;;  %v196_v9 = vld [vmem:[#allocation12 + $0x130] sm:$0xff]  ;;  %v1792_v10 = vld [vmem:[#allocation13 + $0x168] sm:$0xff]  ;;  %s1806_s22 = sld [smem:[#allocation6 + $0x3]]  ;;  %s1353_s3 = sshll.u32 %s2238_s9, 4  ;;  %s1354_s3 = int_to_ptr.hbm [resolvable:$true] %s1353_s3 }
  0x27   :  { %234 = vmatpush.msra.mxu1 %v204_v6  ;;  %v198_v11 = vld [vmem:[#allocation12 + $0x140] sm:$0xff]  ;;  %v1794_v12 = vld [vmem:[#allocation13 + $0x150] sm:$0xff]  ;;  %v191_v13 = vld [vmem:[#allocation12 + $0x108] sm:$0xff]  ;;  %335 = vmatpush.msra.mxu3 %v1792_v10  ;;  %s1810_s27 = sld [smem:[#allocation6 + $0x4]] }
  0x28   :  { %216 = vmatpush.msra.mxu0 %v197_v4  ;;  %256 = vmatpush.msra.mxu2 %v199_v5  ;;  %v193_v14 = vld [vmem:[#allocation12 + $0x118] sm:$0xff]  ;;  %v195_v15 = vld [vmem:[#allocation12 + $0x128] sm:$0xff]  ;;  %v188_v17 = vld [vmem:[#allocation12 + $0xf0] sm:$0xff]  ;;  %s1813_s28 = sld [smem:[#allocation6 + $0x5]] }
  0x29   :  { %235 = vmatpush.msra.mxu1 %v201_v7  ;;  %v1801_v16 = vld [vmem:[#allocation13 + $0x138] sm:$0xff]  ;;  %v190_v18 = vld [vmem:[#allocation12 + $0x100] sm:$0xff]  ;;  %336 = vmatpush.msra.mxu3 %v1794_v12  ;;  %v192_v19 = vld [vmem:[#allocation12 + $0x110] sm:$0xff]  ;;  %s133_s2 = scalar_lea.vmem [#allocation10], %s1796_s6 }
  0x2a   :  { %217 = vmatpush.msra.mxu0 %v194_v8  ;;  %257 = vmatpush.msra.mxu2 %v196_v9  ;;  %v1808_v20 = vld [vmem:[#allocation13 + $0x120] sm:$0xff]  ;;  %v185_v21 = vld [vmem:[#allocation12 + $0xd8] sm:$0xff]  ;;  %v187_v22 = vld [vmem:[#allocation12 + $0xe8] sm:$0xff]  ;;  %s137_s29 = scalar_lea.vmem [#allocation10], %s1799_s7 }
  0x2b   :  { %236 = vmatpush.msra.mxu1 %v198_v11  ;;  %337 = vmatpush.msra.mxu3 %v1801_v16  ;;  %v189_v23 = vld [vmem:[#allocation12 + $0xf8] sm:$0xff]  ;;  %v1815_v24 = vld [vmem:[#allocation13 + $0x108] sm:$0xff]  ;;  %v182_v25 = vld [vmem:[#allocation12 + $0xc0] sm:$0xff]  ;;  %s141_s30 = scalar_lea.vmem [#allocation10], %s1803_s0 }
  0x2c   :  { %218 = vmatpush.msra.mxu0 %v191_v13  ;;  %258 = vmatpush.msra.mxu2 %v193_v14  ;;  %v184_v26 = vld [vmem:[#allocation12 + $0xd0] sm:$0xff]  ;;  %v186_v27 = vld [vmem:[#allocation12 + $0xe0] sm:$0xff]  ;;  %v179_v29 = vld [vmem:[#allocation12 + $0xa8] sm:$0xff]  ;;  %s145_s11 = scalar_lea.vmem [#allocation10], %s1806_s22 }
  0x2d   :  { %237 = vmatpush.msra.mxu1 %v195_v15  ;;  %338 = vmatpush.msra.mxu3 %v1808_v20  ;;  %v1818_v28 = vld [vmem:[#allocation13 + $0xf0] sm:$0xff]  ;;  %v181_v30 = vld [vmem:[#allocation12 + $0xb8] sm:$0xff]  ;;  %v183_v31 = vld [vmem:[#allocation12 + $0xc8] sm:$0xff]  ;;  %s149_s12 = scalar_lea.vmem [#allocation10], %s1810_s27 }
  0x2e   :  { %219 = vmatpush.msra.mxu0 %v188_v17  ;;  %259 = vmatpush.msra.mxu2 %v190_v18  ;;  %v1821_v32 = vld [vmem:[#allocation13 + $0xd8] sm:$0xff]  ;;  %v176_v33 = vld [vmem:[#allocation12 + $0x90] sm:$0xff]  ;;  %v178_v34 = vld [vmem:[#allocation12 + $0xa0] sm:$0xff]  ;;  %s153_s13 = scalar_lea.vmem [#allocation10], %s1813_s28 }
  0x2f   :  { %238 = vmatpush.msra.mxu1 %v192_v19  ;;  %339 = vmatpush.msra.mxu3 %v1815_v24  ;;  %v173_v35 = vld [vmem:[#allocation12 + $0x78] sm:$0xff]  ;;  %v180_v36 = vld [vmem:[#allocation12 + $0xb0] sm:$0xff]  ;;  %v1824_v37 = vld [vmem:[#allocation13 + $0xc0] sm:$0xff] }
  0x30   :  { %220 = vmatpush.msra.mxu0 %v185_v21  ;;  %260 = vmatpush.msra.mxu2 %v187_v22  ;;  %v175_v38 = vld [vmem:[#allocation12 + $0x88] sm:$0xff]  ;;  %v177_v39 = vld [vmem:[#allocation12 + $0x98] sm:$0xff]  ;;  %v170_v44 = vld [vmem:[#allocation12 + $0x60] sm:$0xff] }
  0x31   :  { %239 = vmatpush.msra.mxu1 %v189_v23  ;;  %340 = vmatpush.msra.mxu3 %v1818_v28  ;;  %v1827_v40 = vld [vmem:[#allocation13 + $0xa8] sm:$0xff]  ;;  %v172_v45 = vld [vmem:[#allocation12 + $0x70] sm:$0xff]  ;;  %v174_v47 = vld [vmem:[#allocation12 + $0x80] sm:$0xff] }
  0x32   :  { %221 = vmatpush.msra.mxu0 %v182_v25  ;;  %261 = vmatpush.msra.mxu2 %v184_v26  ;;  %v134_v41 = vld [vmem:[%s133_s2] sm:$0x1]  ;;  %v1834_v48 = vld [vmem:[#allocation13 + $0x90] sm:$0xff]  ;;  %v169_v51 = vld [vmem:[#allocation12 + $0x58] sm:$0xff] }
  0x33   :  { %240 = vmatpush.msra.mxu1 %v186_v27  ;;  %341 = vmatpush.msra.mxu3 %v1821_v32  ;;  %v138_v42 = vld [vmem:[%s137_s29] sm:$0x1]  ;;  %135 = vst [vmem:[#allocation2] sm:$0x1] %v134_v41  ;;  %v1839_v54 = vld [vmem:[#allocation13 + $0x78] sm:$0xff]  ;;  %v164_v55 = vld [vmem:[#allocation12 + $0x30] sm:$0xff] }
  0x34   :  { %222 = vmatpush.msra.mxu0 %v179_v29  ;;  %262 = vmatpush.msra.mxu2 %v181_v30  ;;  %v142_v43 = vld [vmem:[%s141_s30] sm:$0x1]  ;;  %139 = vst [vmem:[#allocation2 + $0x1] sm:$0x1] %v138_v42  ;;  %v166_v56 = vld [vmem:[#allocation12 + $0x40] sm:$0xff]  ;;  %v168_v57 = vld [vmem:[#allocation12 + $0x50] sm:$0xff] }
  0x35   :  { %241 = vmatpush.msra.mxu1 %v183_v31  ;;  %342 = vmatpush.msra.mxu3 %v1824_v37  ;;  %v146_v46 = vld [vmem:[%s145_s11] sm:$0x1]  ;;  %143 = vst [vmem:[#allocation2 + $0x2] sm:$0x1] %v142_v43  ;;  %v1842_v58 = vld [vmem:[#allocation13 + $0x60] sm:$0xff]  ;;  %v161_v59 = vld [vmem:[#allocation12 + $0x18] sm:$0xff] }
  0x36   :  { %223 = vmatpush.msra.mxu0 %v176_v33  ;;  %263 = vmatpush.msra.mxu2 %v178_v34  ;;  %v150_v49 = vld [vmem:[%s149_s12] sm:$0x1]  ;;  %147 = vst [vmem:[#allocation2 + $0x3] sm:$0x1] %v146_v46  ;;  %v165_v61 = vld [vmem:[#allocation12 + $0x38] sm:$0xff]  ;;  %v158_v63 = vld [vmem:[#allocation12] sm:$0xff] }
  0x37   :  { %242 = vmatpush.msra.mxu1 %v180_v36  ;;  %v167_v50 = vld [vmem:[#allocation12 + $0x48] sm:$0xff]  ;;  %343 = vmatpush.msra.mxu3 %v1827_v40  ;;  %151 = vst [vmem:[#allocation2 + $0x4] sm:$0x1] %v150_v49  ;;  %v160_v0 = vld [vmem:[#allocation12 + $0x10] sm:$0xff]  ;;  %v162_v2 = vld [vmem:[#allocation12 + $0x20] sm:$0xff] }
  0x38   :  { %224 = vmatpush.msra.mxu0 %v173_v35  ;;  %264 = vmatpush.msra.mxu2 %v175_v38  ;;  %v154_v52 = vld [vmem:[%s153_s13] sm:$0x1]  ;;  %v1848_v1 = vld [vmem:[#allocation13 + $0x170] sm:$0xff]  ;;  %v1853_v4 = vld [vmem:[#allocation13 + $0x158] sm:$0xff] }
  0x39   :  { %243 = vmatpush.msra.mxu1 %v177_v39  ;;  %v171_v53 = vld [vmem:[#allocation12 + $0x68] sm:$0xff]  ;;  %344 = vmatpush.msra.mxu3 %v1834_v48  ;;  %155 = vst [vmem:[#allocation2 + $0x5] sm:$0x1] %v154_v52  ;;  %v1851_v3 = vld [vmem:[#allocation13 + $0x30] sm:$0xff]  ;;  %v1856_v7 = vld [vmem:[#allocation13 + $0x18] sm:$0xff] }
  0x3a   :  { %225 = vmatpush.msra.mxu0 %v170_v44  ;;  %265 = vmatpush.msra.mxu2 %v172_v45  ;;  %v163_v60 = vld [vmem:[#allocation12 + $0x28] sm:$0xff]  ;;  %v1859_v9 = vld [vmem:[#allocation13 + $0x140] sm:$0xff]  ;;  %v1868_v14 = vld [vmem:[#allocation7] sm:$0x1] }
  0x3b   :  { %244 = vmatpush.msra.mxu1 %v174_v47  ;;  %345 = vmatpush.msra.mxu3 %v1839_v54  ;;  %v1845_v62 = vld [vmem:[#allocation13 + $0x48] sm:$0xff]  ;;  %v1863_v11 = vld [vmem:[#allocation13] sm:$0xff]  ;;  %v1871_v15 = vld [vmem:[#allocation13 + $0x178] sm:$0xff] }
  0x3c   :  { %226 = vmatpush.msra.mxu0 %v167_v50  ;;  %266 = vmatpush.msra.mxu2 %v169_v51  ;;  %v159_v5 = vld [vmem:[#allocation12 + $0x8] sm:$0xff]  ;;  %v1874_v17 = vld [vmem:[#allocation13 + $0x110] sm:$0xff]  ;;  %v1878_v18 = vld [vmem:[#allocation13 + $0x160] sm:$0xff] }
  0x3d   :  { %245 = vmatpush.msra.mxu1 %v171_v53  ;;  %346 = vmatpush.msra.mxu3 %v1842_v58  ;;  %v1866_v13 = vld [vmem:[#allocation13 + $0x128] sm:$0xff]  ;;  %v1880_v19 = vld [vmem:[#allocation13 + $0xf8] sm:$0xff]  ;;  %v1888_v22 = vld [vmem:[#allocation13 + $0xe0] sm:$0xff] }
  0x3e   :  { %227 = vmatpush.msra.mxu0 %v164_v55  ;;  %267 = vmatpush.msra.mxu2 %v166_v56  ;;  %v1885_v21 = vld [vmem:[#allocation13 + $0x148] sm:$0xff]  ;;  %v1893_v23 = vld [vmem:[#allocation13 + $0x130] sm:$0xff]  ;;  %v1901_v26 = vld [vmem:[#allocation13 + $0x118] sm:$0xff] }
  0x3f   :  { %246 = vmatpush.msra.mxu1 %v168_v57  ;;  %347 = vmatpush.msra.mxu3 %v1845_v62  ;;  %v1896_v25 = vld [vmem:[#allocation13 + $0xc8] sm:$0xff]  ;;  %v1904_v27 = vld [vmem:[#allocation13 + $0xb0] sm:$0xff]  ;;  %v1909_v29 = vld [vmem:[#allocation13 + $0x100] sm:$0xff] }
  0x40   :  { %228 = vmatpush.msra.mxu0 %v161_v59  ;;  %268 = vmatpush.msra.mxu2 %v163_v60  ;;  %v156_v6 = vld [vmem:[#allocation2] sm:$0x3f]  ;;  %v1912_v30 = vld [vmem:[#allocation13 + $0x98] sm:$0xff]  ;;  %v1920_v33 = vld [vmem:[#allocation13 + $0x80] sm:$0xff] }
  0x41   :  { %247 = vmatpush.msra.mxu1 %v165_v61  ;;  %v157_v8 = vmax.f32 %v156_v6, 0.0  ;;  %348 = vmatpush.msra.mxu3 %v1851_v3  ;;  %v1917_v31 = vld [vmem:[#allocation13 + $0xe8] sm:$0xff]  ;;  %v1925_v34 = vld [vmem:[#allocation13 + $0xd0] sm:$0xff]  ;;  %v1933_v36 = vld [vmem:[#allocation13 + $0xb8] sm:$0xff] }
  0x42   :  { %229 = vmatpush.msra.mxu0 %v158_v63  ;;  %269 = vmatpush.msra.mxu2 %v160_v0  ;;  %v1928_v35 = vld [vmem:[#allocation13 + $0x68] sm:$0xff]  ;;  %v1936_v38 = vld [vmem:[#allocation13 + $0x50] sm:$0xff]  ;;  %v1941_v39 = vld [vmem:[#allocation13 + $0xa0] sm:$0xff] }
  0x43   :  { %248 = vmatpush.msra.mxu1 %v162_v2  ;;  %270 = vmatmul.f32.vlgmr.msra.gmra.mxu2 %v157_v8  ;;  %v1944_v41 = vld [vmem:[#allocation13 + $0x38] sm:$0xff]  ;;  %v1949_v42 = vld [vmem:[#allocation13 + $0x88] sm:$0xff]  ;;  %v1952_v43 = vld [vmem:[#allocation13 + $0x20] sm:$0xff] }
  0x44   :  { %355 = vmatpush.msrb.mxu0 %v1848_v1  ;;  %506 = vmatpush.msrb.mxu2 %v1792_v10  ;;  %v1957_v44 = vld [vmem:[#allocation13 + $0x70] sm:$0xff]  ;;  %v1960_v45 = vld [vmem:[#allocation13 + $0x8] sm:$0xff]  ;;  %v1965_v46 = vld [vmem:[#allocation13 + $0x58] sm:$0xff] }
  0x45   :  { %249 = vmatpush.msra.mxu1 %v159_v5  ;;  %349 = vmatpush.msra.mxu3 %v1856_v7  ;;  %v1971_v47 = vld [vmem:[#allocation13 + $0x40] sm:$0xff]  ;;  %v1976_v49 = vld [vmem:[#allocation13 + $0x28] sm:$0xff]  ;;  %v1982_v50 = vld [vmem:[#allocation13 + $0x10] sm:$0xff] }
  0x46   :  { %356 = vmatpush.msrb.mxu0 %v1853_v4  ;;  %250 = vmatmul.f32.vlgmr.msra.gmra.mxu1 %v157_v8 }
  0x47   :  { %230 = vmatmul.f32.vlgmr.msra.gmra.mxu0 %v157_v8  ;;  %350 = vmatpush.msra.mxu3 %v1863_v11 }
  0x48   :  { %357 = vmatpush.msrb.mxu0 %v1859_v9  ;;  %351 = vmatmul.f32.vlgmr.msra.gmra.mxu3 %v1868_v14 }
  0x49   :  { %375 = vmatpush.msrb.mxu1 %v1871_v15  ;;  %526 = vmatpush.msrb.mxu3 %v1848_v1 }
  0x4a   :  { %358 = vmatpush.msrb.mxu0 %v1866_v13  ;;  %507 = vmatpush.msrb.mxu2 %v1794_v12 }
  0x4b   :  { %376 = vmatpush.msrb.mxu1 %v1878_v18  ;;  %527 = vmatpush.msrb.mxu3 %v1853_v4 }
  0x4c   :  { %359 = vmatpush.msrb.mxu0 %v1874_v17  ;;  %508 = vmatpush.msrb.mxu2 %v1801_v16 }
  0x4d   :  { %377 = vmatpush.msrb.mxu1 %v1885_v21  ;;  %528 = vmatpush.msrb.mxu3 %v1859_v9 }
  0x4e   :  { %360 = vmatpush.msrb.mxu0 %v1880_v19  ;;  %509 = vmatpush.msrb.mxu2 %v1808_v20 }
  0x4f   :  { %378 = vmatpush.msrb.mxu1 %v1893_v23  ;;  %529 = vmatpush.msrb.mxu3 %v1866_v13 }
  0x50   :  { %361 = vmatpush.msrb.mxu0 %v1888_v22  ;;  %510 = vmatpush.msrb.mxu2 %v1815_v24 }
  0x51   :  { %379 = vmatpush.msrb.mxu1 %v1901_v26  ;;  %530 = vmatpush.msrb.mxu3 %v1874_v17 }
  0x52   :  { %362 = vmatpush.msrb.mxu0 %v1896_v25  ;;  %511 = vmatpush.msrb.mxu2 %v1818_v28 }
  0x53   :  { %380 = vmatpush.msrb.mxu1 %v1909_v29  ;;  %531 = vmatpush.msrb.mxu3 %v1880_v19 }
  0x54   :  { %363 = vmatpush.msrb.mxu0 %v1904_v27  ;;  %512 = vmatpush.msrb.mxu2 %v1821_v32 }
  0x55   :  { %381 = vmatpush.msrb.mxu1 %v1917_v31  ;;  %532 = vmatpush.msrb.mxu3 %v1888_v22 }
  0x56   :  { %364 = vmatpush.msrb.mxu0 %v1912_v30  ;;  %513 = vmatpush.msrb.mxu2 %v1824_v37 }
  0x57   :  { %382 = vmatpush.msrb.mxu1 %v1925_v34  ;;  %533 = vmatpush.msrb.mxu3 %v1896_v25 }
  0x58   :  { %365 = vmatpush.msrb.mxu0 %v1920_v33  ;;  %514 = vmatpush.msrb.mxu2 %v1827_v40 }
  0x59   :  { %383 = vmatpush.msrb.mxu1 %v1933_v36  ;;  %534 = vmatpush.msrb.mxu3 %v1904_v27 }
  0x5a   :  { %366 = vmatpush.msrb.mxu0 %v1928_v35  ;;  %515 = vmatpush.msrb.mxu2 %v1834_v48 }
  0x5b   :  { %384 = vmatpush.msrb.mxu1 %v1941_v39  ;;  %535 = vmatpush.msrb.mxu3 %v1912_v30 }
  0x5c   :  { %367 = vmatpush.msrb.mxu0 %v1936_v38  ;;  %516 = vmatpush.msrb.mxu2 %v1839_v54 }
  0x5d   :  { %385 = vmatpush.msrb.mxu1 %v1949_v42  ;;  %536 = vmatpush.msrb.mxu3 %v1920_v33 }
  0x5e   :  { %368 = vmatpush.msrb.mxu0 %v1944_v41  ;;  %517 = vmatpush.msrb.mxu2 %v1842_v58 }
  0x5f   :  { %386 = vmatpush.msrb.mxu1 %v1957_v44  ;;  %537 = vmatpush.msrb.mxu3 %v1928_v35 }
  0x60   :  { %369 = vmatpush.msrb.mxu0 %v1952_v43  ;;  %518 = vmatpush.msrb.mxu2 %v1845_v62 }
  0x61   :  { %387 = vmatpush.msrb.mxu1 %v1965_v46  ;;  %538 = vmatpush.msrb.mxu3 %v1936_v38 }
  0x62   :  { %370 = vmatpush.msrb.mxu0 %v1960_v45  ;;  %519 = vmatpush.msrb.mxu2 %v1851_v3 }
  0x63   :  { %371 = vmatmul.f32.vlgmr.msrb.gmra.mxu0 %v1868_v14  ;;  %388 = vmatpush.msrb.mxu1 %v1971_v47 }
  0x64   :  { %546 = vmatpush.msra.mxu0 %v1871_v15  ;;  %539 = vmatpush.msrb.mxu3 %v1944_v41 }
  0x65   :  { %389 = vmatpush.msrb.mxu1 %v1976_v49  ;;  %520 = vmatpush.msrb.mxu2 %v1856_v7 }
  0x66   :  { %547 = vmatpush.msra.mxu0 %v1878_v18  ;;  %540 = vmatpush.msrb.mxu3 %v1952_v43 }
  0x67   :  { %390 = vmatpush.msrb.mxu1 %v1982_v50  ;;  %521 = vmatpush.msrb.mxu2 %v1863_v11 }
  0x68   :  { %548 = vmatpush.msra.mxu0 %v1885_v21  ;;  %391 = vmatmul.f32.vlgmr.msrb.gmra.mxu1 %v1868_v14 }
  0x69   :  { %541 = vmatpush.msrb.mxu3 %v1960_v45  ;;  %677 = vmatpush.msra.mxu1 %v1792_v10  ;;  %v206_v10 = vld [vmem:[%s2233_s4] sm:$0x7]  ;;  %s1708_s4 = smov [#allocation19]  }
  0x6a   :  { %549 = vmatpush.msra.mxu0 %v1893_v23  ;;  %697 = vmatpush.msra.mxu2 %v1848_v1  ;;  %s1362_s16 = sshll.u32 %s1708_s4, 4  ;;  %s1363_s16 = int_to_ptr.vmem [resolvable:$true] %s1362_s16 }
  0x6b   :  { %717 = vmatpush.msra.mxu3 %v1871_v15  ;;  %678 = vmatpush.msra.mxu1 %v1794_v12  ;;  %v209_v12 = vperm.slane %v206_v10, 1 }
  0x6c   :  { %550 = vmatpush.msra.mxu0 %v1901_v26  ;;  %698 = vmatpush.msra.mxu2 %v1853_v4 }
  0x6d   :  { %718 = vmatpush.msra.mxu3 %v1878_v18  ;;  %679 = vmatpush.msra.mxu1 %v1801_v16  ;;  %v208_v16 = vperm.slane %v206_v10, 0 }
  0x6e   :  { %551 = vmatpush.msra.mxu0 %v1909_v29  ;;  %699 = vmatpush.msra.mxu2 %v1859_v9 }
  0x6f   :  { %719 = vmatpush.msra.mxu3 %v1885_v21  ;;  %680 = vmatpush.msra.mxu1 %v1808_v20 }
  0x70   :  { %552 = vmatpush.msra.mxu0 %v1917_v31  ;;  %700 = vmatpush.msra.mxu2 %v1866_v13 }
  0x71   :  { %720 = vmatpush.msra.mxu3 %v1893_v23  ;;  %681 = vmatpush.msra.mxu1 %v1815_v24 }
  0x72   :  { %553 = vmatpush.msra.mxu0 %v1925_v34  ;;  %701 = vmatpush.msra.mxu2 %v1874_v17 }
  0x73   :  { %721 = vmatpush.msra.mxu3 %v1901_v26  ;;  %682 = vmatpush.msra.mxu1 %v1818_v28 }
  0x74   :  { %554 = vmatpush.msra.mxu0 %v1933_v36  ;;  %702 = vmatpush.msra.mxu2 %v1880_v19 }
  0x75   :  { %722 = vmatpush.msra.mxu3 %v1909_v29  ;;  %683 = vmatpush.msra.mxu1 %v1821_v32 }
  0x76   :  { %555 = vmatpush.msra.mxu0 %v1941_v39  ;;  %703 = vmatpush.msra.mxu2 %v1888_v22 }
  0x77   :  { %723 = vmatpush.msra.mxu3 %v1917_v31  ;;  %684 = vmatpush.msra.mxu1 %v1824_v37  ;;  %v210_v37 = vperm.slane %v206_v10, 2 }
  0x78   :  { %556 = vmatpush.msra.mxu0 %v1949_v42  ;;  %704 = vmatpush.msra.mxu2 %v1896_v25 }
  0x79   :  { %724 = vmatpush.msra.mxu3 %v1925_v34  ;;  %685 = vmatpush.msra.mxu1 %v1827_v40 }
  0x7a   :  { %557 = vmatpush.msra.mxu0 %v1957_v44  ;;  %705 = vmatpush.msra.mxu2 %v1904_v27 }
  0x7b   :  { %725 = vmatpush.msra.mxu3 %v1933_v36  ;;  %686 = vmatpush.msra.mxu1 %v1834_v48  ;;  %v327_v48 = vld [vmem:[#allocation15] sm:$0x7] }
  0x7c   :  { %558 = vmatpush.msra.mxu0 %v1965_v46  ;;  %706 = vmatpush.msra.mxu2 %v1912_v30  ;;  %v329_v52 = vperm.slane %v327_v48, 0  ;;  %v331_v5 = vperm.slane %v327_v48, 2 }
  0x7d   :  { %726 = vmatpush.msra.mxu3 %v1941_v39  ;;  %687 = vmatpush.msra.mxu1 %v1839_v54 }
  0x7e   :  { %559 = vmatpush.msra.mxu0 %v1971_v47  ;;  %707 = vmatpush.msra.mxu2 %v1920_v33 }
  0x7f   :  { %727 = vmatpush.msra.mxu3 %v1949_v42  ;;  %688 = vmatpush.msra.mxu1 %v1842_v58  ;;  %v330_v58 = vperm.slane %v327_v48, 1 }
  0x80   :  { %560 = vmatpush.msra.mxu0 %v1976_v49  ;;  %708 = vmatpush.msra.mxu2 %v1928_v35 }
  0x81   :  { %728 = vmatpush.msra.mxu3 %v1957_v44  ;;  %689 = vmatpush.msra.mxu1 %v1845_v62 }
  0x82   :  { %561 = vmatpush.msra.mxu0 %v1982_v50  ;;  %709 = vmatpush.msra.mxu2 %v1936_v38 }
  0x83   :  { %729 = vmatpush.msra.mxu3 %v1965_v46  ;;  %690 = vmatpush.msra.mxu1 %v1851_v3 }
  0x84   :  { %710 = vmatpush.msra.mxu2 %v1944_v41 }
  0x85   :  { %730 = vmatpush.msra.mxu3 %v1971_v47  ;;  %691 = vmatpush.msra.mxu1 %v1856_v7 }
  0x86   :  { %711 = vmatpush.msra.mxu2 %v1952_v43 }
  0x87   :  { %731 = vmatpush.msra.mxu3 %v1976_v49  ;;  %692 = vmatpush.msra.mxu1 %v1863_v11 }
  0x88   :  { %712 = vmatpush.msra.mxu2 %v1960_v45 }
  0x89   :  { %868 = vmatpush.msrb.mxu1 %v1848_v1  ;;  %732 = vmatpush.msra.mxu3 %v1982_v50 }
  0x8b   :  { %869 = vmatpush.msrb.mxu1 %v1853_v4 }
  0x8d   :  { %870 = vmatpush.msrb.mxu1 %v1859_v9 }
  0x8f   :  { %871 = vmatpush.msrb.mxu1 %v1866_v13 }
  0x91   :  { %872 = vmatpush.msrb.mxu1 %v1874_v17 }
  0x93   :  { %873 = vmatpush.msrb.mxu1 %v1880_v19 }
  0x95   :  { %874 = vmatpush.msrb.mxu1 %v1888_v22 }
  0x97   :  { %875 = vmatpush.msrb.mxu1 %v1896_v25 }
  0x99   :  { %876 = vmatpush.msrb.mxu1 %v1904_v27 }
  0x9b   :  { %877 = vmatpush.msrb.mxu1 %v1912_v30 }
  0x9d   :  { %878 = vmatpush.msrb.mxu1 %v1920_v33 }
  0x9f   :  { %879 = vmatpush.msrb.mxu1 %v1928_v35 }
  0xa1   :  { %880 = vmatpush.msrb.mxu1 %v1936_v38 }
  0xa3   :  { %881 = vmatpush.msrb.mxu1 %v1944_v41 }
  0xa5   :  { %882 = vmatpush.msrb.mxu1 %v1952_v43 }
  0xa7   :  { %883 = vmatpush.msrb.mxu1 %v1960_v45 }
  0xc3   :  { %v251_v20 = vpop.f32.mrf.mxu1 }
  0xc4   :  { %v231_v24 = vpop.f32.mrf.mxu0  ;;  %v252_v28 = vadd.f32 %v251_v20, %v209_v12 }
  0xc5   :  { %v232_v32 = vadd.f32 %v231_v24, %v208_v16 }
  0xc6   :  { %275 = vst [vmem:[#allocation3 + $0x8] sm:$0x3f] %v252_v28  ;;  %v271_v40 = vpop.f32.mrf.mxu2 }
  0xc7   :  { %274 = vst [vmem:[#allocation3] sm:$0x3f] %v232_v32  ;;  %v272_v51 = vadd.f32 %v271_v40, %v210_v37 }
  0xc9   :  { %276 = vst [vmem:[#allocation3 + $0x10] sm:$0x3f] %v272_v51 }
  0xcb   :  { %v352_v53 = vpop.f32.mrf.mxu3 }
  0xcc   :  { %v353_v54 = vadd.f32 %v352_v53, %v329_v52 }
  0xd0   :  { %v278_v55 = vld [vmem:[#allocation3] ss:$8 sm:$0x7] }
  0xd1   :  { %v395_v56 = vadd.f32 %v353_v54, %v278_v55  ;;  %v416_v63 = vrot.slane %v278_v55, 1  ;;  %v439_v35 = vrot.slane %v278_v55, 2 }
  0xd3   :  { %v1393_v57 = vmul.f32 -1.442695, %v395_v56 }
  0xd5   :  { %1419 = vpow2.f32 %v1393_v57 }
  0xdb   :  { %v1420_v59 = vpop.eup %1419 }
  0xdc   :  { %v399_v60 = vadd.f32 1.0, %v1420_v59 }
  0xde   :  { %1421 = vrcp.f32 %v399_v60  ;;  %v411_v6 = vand.u32 2147483648, %v399_v60  ;;  %vm405_vm0 = vweird.f32 %v399_v60  ;;  %v409_v11 = vand.u32 2147483647, %v399_v60 }
  0xe0   :  { %v372_v61 = vpop.f32.mrf.mxu0  ;;  %v412_v22 = vor.u32 1.1754944e-38, %v411_v6  ;;  %vm410_vm3 = vcmp.eq.f32.partialorder %v409_v11, 8.507059e+37 }
  0xe1   :  { %v373_v62 = vadd.f32 %v372_v61, %v330_v58 }
  0xe3   :  { %v418_v0 = vadd.f32 %v416_v63, %v373_v62 }
  0xe4   :  { %v1422_v2 = vpop.eup %1421 }
  0xe5   :  { %v1394_v1 = vmul.f32 -1.442695, %v418_v0  ;;  %v401_v3 = vmul.f32 %v1422_v2, %v399_v60  ;;  %v392_v8 = vpop.f32.mrf.mxu1  ;;  %vm406_vm1 = vweird.f32 %v1422_v2 }
  0xe6   :  { %v393_v19 = vadd.f32 %v392_v8, %v331_v5  ;;  %vm407_vm2 = vmor %vm405_vm0, %vm406_vm1 }
  0xe7   :  { %1423 = vpow2.f32 %v1394_v1  ;;  %v402_v4 = vsub.f32 1.0, %v401_v3 }
  0xe9   :  { %v403_v9 = vmul.f32 %v1422_v2, %v402_v4 }
  0xeb   :  { %v404_v17 = vadd.f32 %v1422_v2, %v403_v9 }
  0xed   :  { %v1424_v7 = vpop.eup %1423  ;;  %v408_v25 = vsel %vm407_vm2, %v1422_v2, %v404_v17 }
  0xee   :  { %v422_v13 = vadd.f32 1.0, %v1424_v7  ;;  %v413_v27 = vsel %vm410_vm3, %v412_v22, %v408_v25 }
  0xef   :  { %v438_v30 = vmul.f32 %v413_v27, %v393_v19 }
  0xf0   :  { %1425 = vrcp.f32 %v422_v13  ;;  %v434_v45 = vand.u32 2147483648, %v422_v13  ;;  %v432_v12 = vand.u32 2147483647, %v422_v13  ;;  %vm428_vm5 = vweird.f32 %v422_v13 }
  0xf1   :  { %v441_v41 = vadd.f32 %v439_v35, %v438_v30  ;;  %v837_v35 = vld [vmem:[#allocation13 + $0x168] sm:$0xff] }
  0xf2   :  { %v435_v20 = vor.u32 1.1754944e-38, %v434_v45  ;;  %vm433_vm7 = vcmp.eq.f32.partialorder %v432_v12, 8.507059e+37  ;;  %848 = vmatpush.msrb.mxu0 %v837_v35  ;;  %v2104_v45 = vld [vmem:[#allocation15] sm:$0x7] }
  0xf3   :  { %1427 = vtanh.f32 %v441_v41  ;;  %v831_v41 = vld [vmem:[#allocation13 + $0x138] sm:$0xff]  ;;  %v671_v12 = vperm.slane %v2104_v45, 0 }
  0xf6   :  { %v1426_v33 = vpop.eup %1425 }
  0xf7   :  { %v424_v38 = vmul.f32 %v1426_v33, %v422_v13  ;;  %vm429_vm4 = vweird.f32 %v1426_v33 }
  0xf8   :  { %vm430_vm6 = vmor %vm428_vm5, %vm429_vm4 }
  0xf9   :  { %v425_v43 = vsub.f32 1.0, %v424_v38  ;;  %v1428_v37 = vpop.eup %1427  ;;  %v834_v38 = vld [vmem:[#allocation13 + $0x150] sm:$0xff] }
  0xfa   :  { %849 = vmatpush.msrb.mxu0 %v834_v38 }
  0xfb   :  { %v426_v10 = vmul.f32 %v1426_v33, %v425_v43  ;;  %v828_v43 = vld [vmem:[#allocation13 + $0x120] sm:$0xff] }
  0xfc   :  { %850 = vmatpush.msrb.mxu0 %v831_v41 }
  0xfd   :  { %v427_v16 = vadd.f32 %v1426_v33, %v426_v10  ;;  %v825_v10 = vld [vmem:[#allocation13 + $0x108] sm:$0xff] }
  0xfe   :  { %851 = vmatpush.msrb.mxu0 %v828_v43 }
  0xff   :  { %v431_v24 = vsel %vm430_vm6, %v1426_v33, %v427_v16  ;;  %v822_v16 = vld [vmem:[#allocation13 + $0xf0] sm:$0xff] }
 0x100   :  { %v436_v28 = vsel %vm433_vm7, %v435_v20, %v431_v24  ;;  %852 = vmatpush.msrb.mxu0 %v825_v10  ;;  %v819_v20 = vld [vmem:[#allocation13 + $0xd8] sm:$0xff] }
 0x101   :  { %v443_v32 = vsub.f32 1.0, %v436_v28  ;;  %v445_v48 = vmul.f32 %v436_v28, %v1868_v14  ;;  %v498_v14 = vld [vmem:[#allocation15] sm:$0x7] }
 0x102   :  { %v502_v59 = vperm.slane %v498_v14, 2  ;;  %853 = vmatpush.msrb.mxu0 %v822_v16 }
 0x103   :  { %v444_v40 = vmul.f32 %v1428_v37, %v443_v32  ;;  %v816_v32 = vld [vmem:[#allocation13 + $0xc0] sm:$0xff] }
 0x104   :  { %854 = vmatpush.msrb.mxu0 %v819_v20  ;;  %v2107_v37 = vld [vmem:[#allocation3 + $0x2] ss:$8 sm:$0x7] }
 0x105   :  { %v2075_v51 = vadd.f32 %v445_v48, %v444_v40  ;;  %v672_v48 = vperm.slane %v2104_v45, 1 }
 0x106   :  { %855 = vmatpush.msrb.mxu0 %v816_v32 }
 0x107   :  { %447 = vst [vmem:[#allocation4] sm:$0x1] %v2075_v51  ;;  %522 = vmatmul.f32.vlgmr.msrb.gmra.mxu2 %v2075_v51  ;;  %542 = vmatmul.f32.vlgmr.msrb.gmra.mxu3 %v2075_v51 }
 0x108   :  { %562 = vmatmul.f32.vlgmr.msra.gmra.mxu0 %v2075_v51  ;;  %888 = vmatpush.msrb.mxu2 %v1871_v15  ;;  %v500_v15 = vperm.slane %v498_v14, 0 }
 0x109   :  { %1019 = vmatpush.msrb.mxu3 %v837_v35 }
 0x10a   :  { %889 = vmatpush.msrb.mxu2 %v1878_v18  ;;  %v501_v18 = vperm.slane %v498_v14, 1 }
 0x10b   :  { %1020 = vmatpush.msrb.mxu3 %v834_v38 }
 0x10c   :  { %890 = vmatpush.msrb.mxu2 %v1885_v21  ;;  %v449_v21 = vld [vmem:[#allocation3 + $0x1] ss:$8 sm:$0x7] }
 0x10d   :  { %v610_v7 = vrot.slane %v449_v21, 2  ;;  %1021 = vmatpush.msrb.mxu3 %v831_v41 }
 0x10e   :  { %891 = vmatpush.msrb.mxu2 %v1893_v23 }
 0x10f   :  { %1022 = vmatpush.msrb.mxu3 %v828_v43 }
 0x110   :  { %892 = vmatpush.msrb.mxu2 %v1901_v26 }
 0x111   :  { %1023 = vmatpush.msrb.mxu3 %v825_v10 }
 0x112   :  { %893 = vmatpush.msrb.mxu2 %v1909_v29 }
 0x113   :  { %1024 = vmatpush.msrb.mxu3 %v822_v16 }
 0x114   :  { %894 = vmatpush.msrb.mxu2 %v1917_v31 }
 0x115   :  { %1025 = vmatpush.msrb.mxu3 %v819_v20 }
 0x116   :  { %895 = vmatpush.msrb.mxu2 %v1925_v34  ;;  %v587_v34 = vrot.slane %v449_v21, 1 }
 0x117   :  { %1026 = vmatpush.msrb.mxu3 %v816_v32 }
 0x118   :  { %896 = vmatpush.msrb.mxu2 %v1933_v36 }
 0x11a   :  { %897 = vmatpush.msrb.mxu2 %v1941_v39 }
 0x11c   :  { %898 = vmatpush.msrb.mxu2 %v1949_v42 }
 0x11e   :  { %899 = vmatpush.msrb.mxu2 %v1957_v44 }
 0x120   :  { %900 = vmatpush.msrb.mxu2 %v1965_v46 }
 0x122   :  { %901 = vmatpush.msrb.mxu2 %v1971_v47 }
 0x124   :  { %902 = vmatpush.msrb.mxu2 %v1976_v49 }
 0x126   :  { %903 = vmatpush.msrb.mxu2 %v1982_v50 }
 0x185   :  { %v563_v62 = vpop.f32.mrf.mxu0 }
 0x186   :  { %v564_v2 = vadd.f32 %v563_v62, %v502_v59 }
 0x18a   :  { %v523_v23 = vpop.f32.mrf.mxu2  ;;  %v543_v26 = vpop.f32.mrf.mxu3 }
 0x18b   :  { %v524_v29 = vadd.f32 %v523_v23, %v500_v15  ;;  %v544_v31 = vadd.f32 %v543_v26, %v501_v18  ;;  %v810_v15 = vld [vmem:[#allocation13 + $0x90] sm:$0xff]  ;;  %v758_v23 = vrot.slane %v2107_v37, 1  ;;  %v807_v26 = vld [vmem:[#allocation13 + $0x78] sm:$0xff] }
 0x18d   :  { %v566_v36 = vadd.f32 %v524_v29, %v449_v21  ;;  %v589_v39 = vadd.f32 %v587_v34, %v544_v31  ;;  %v804_v31 = vld [vmem:[#allocation13 + $0x60] sm:$0xff] }
 0x18f   :  { %v1395_v42 = vmul.f32 -1.442695, %v566_v36  ;;  %v1396_v44 = vmul.f32 -1.442695, %v589_v39  ;;  %v801_v36 = vld [vmem:[#allocation13 + $0x48] sm:$0xff]  ;;  %v798_v39 = vld [vmem:[#allocation13 + $0x30] sm:$0xff] }
 0x191   :  { %1429 = vpow2.f32 %v1395_v42 }
 0x192   :  { %1431 = vpow2.f32 %v1396_v44  ;;  %v795_v44 = vld [vmem:[#allocation13 + $0x18] sm:$0xff] }
 0x197   :  { %v1430_v46 = vpop.eup %1429 }
 0x198   :  { %v1432_v47 = vpop.eup %1431  ;;  %v570_v49 = vadd.f32 1.0, %v1430_v46 }
 0x199   :  { %v593_v52 = vadd.f32 1.0, %v1432_v47  ;;  %v792_v47 = vld [vmem:[#allocation13] sm:$0xff] }
 0x19a   :  { %1433 = vrcp.f32 %v570_v49  ;;  %v582_v57 = vand.u32 2147483648, %v570_v49  ;;  %v580_v61 = vand.u32 2147483647, %v570_v49  ;;  %vm576_vm9 = vweird.f32 %v570_v49 }
 0x19b   :  { %1435 = vrcp.f32 %v593_v52  ;;  %v605_v8 = vand.u32 2147483648, %v593_v52  ;;  %vm599_vm13 = vweird.f32 %v593_v52  ;;  %v603_v9 = vand.u32 2147483647, %v593_v52 }
 0x19c   :  { %v583_v1 = vor.u32 1.1754944e-38, %v582_v57  ;;  %vm581_vm11 = vcmp.eq.f32.partialorder %v580_v61, 8.507059e+37 }
 0x19d   :  { %v606_v17 = vor.u32 1.1754944e-38, %v605_v8  ;;  %vm604_vm15 = vcmp.eq.f32.partialorder %v603_v9, 8.507059e+37 }
 0x1a0   :  { %v1434_v50 = vpop.eup %1433 }
 0x1a1   :  { %v1436_v53 = vpop.eup %1435  ;;  %v572_v54 = vmul.f32 %v1434_v50, %v570_v49  ;;  %vm577_vm8 = vweird.f32 %v1434_v50 }
 0x1a2   :  { %v595_v55 = vmul.f32 %v1436_v53, %v593_v52  ;;  %vm578_vm10 = vmor %vm576_vm9, %vm577_vm8  ;;  %vm600_vm12 = vweird.f32 %v1436_v53 }
 0x1a3   :  { %v573_v56 = vsub.f32 1.0, %v572_v54  ;;  %vm601_vm14 = vmor %vm599_vm13, %vm600_vm12 }
 0x1a4   :  { %v596_v58 = vsub.f32 1.0, %v595_v55 }
 0x1a5   :  { %v574_v60 = vmul.f32 %v1434_v50, %v573_v56  ;;  %v673_v56 = vperm.slane %v2104_v45, 2  ;;  %v2124_v45 = vld [vmem:[#allocation13 + $0x160] sm:$0xff] }
 0x1a6   :  { %v597_v63 = vmul.f32 %v1436_v53, %v596_v58 }
 0x1a7   :  { %v575_v0 = vadd.f32 %v1434_v50, %v574_v60 }
 0x1a8   :  { %v598_v5 = vadd.f32 %v1436_v53, %v597_v63 }
 0x1a9   :  { %v579_v3 = vsel %vm578_vm10, %v1434_v50, %v575_v0 }
 0x1aa   :  { %v584_v4 = vsel %vm581_vm11, %v583_v1, %v579_v3  ;;  %v602_v13 = vsel %vm601_vm14, %v1436_v53, %v598_v5 }
 0x1ab   :  { %v609_v6 = vmul.f32 %v584_v4, %v564_v2  ;;  %v607_v19 = vsel %vm604_vm15, %v606_v17, %v602_v13  ;;  %v781_v4 = vrot.slane %v2107_v37, 2 }
 0x1ac   :  { %v614_v22 = vsub.f32 1.0, %v607_v19  ;;  %v616_v30 = vmul.f32 %v607_v19, %v2075_v51  ;;  %v813_v51 = vld [vmem:[#allocation13 + $0xa8] sm:$0xff] }
 0x1ad   :  { %v612_v11 = vadd.f32 %v610_v7, %v609_v6  ;;  %856 = vmatpush.msrb.mxu0 %v813_v51  ;;  %1027 = vmatpush.msrb.mxu3 %v813_v51 }
 0x1af   :  { %1437 = vtanh.f32 %v612_v11  ;;  %857 = vmatpush.msrb.mxu0 %v810_v15  ;;  %1028 = vmatpush.msrb.mxu3 %v810_v15 }
 0x1b1   :  { %858 = vmatpush.msrb.mxu0 %v807_v26  ;;  %1029 = vmatpush.msrb.mxu3 %v807_v26 }
 0x1b3   :  { %859 = vmatpush.msrb.mxu0 %v804_v31  ;;  %1030 = vmatpush.msrb.mxu3 %v804_v31 }
 0x1b5   :  { %v1438_v25 = vpop.eup %1437  ;;  %860 = vmatpush.msrb.mxu0 %v801_v36  ;;  %1031 = vmatpush.msrb.mxu3 %v801_v36 }
 0x1b6   :  { %v615_v27 = vmul.f32 %v1438_v25, %v614_v22 }
 0x1b7   :  { %861 = vmatpush.msrb.mxu0 %v798_v39  ;;  %1032 = vmatpush.msrb.mxu3 %v798_v39 }
 0x1b8   :  { %v2098_v33 = vadd.f32 %v616_v30, %v615_v27 }
 0x1b9   :  { %862 = vmatpush.msrb.mxu0 %v795_v44  ;;  %1033 = vmatpush.msrb.mxu3 %v795_v44 }
 0x1ba   :  { %618 = vst [vmem:[#allocation4 + $0x1] sm:$0x1] %v2098_v33  ;;  %693 = vmatmul.f32.vlgmr.msra.gmra.mxu1 %v2098_v33  ;;  %713 = vmatmul.f32.vlgmr.msra.gmra.mxu2 %v2098_v33 }
 0x1bb   :  { %733 = vmatmul.f32.vlgmr.msra.gmra.mxu3 %v2098_v33  ;;  %1190 = vmatpush.msra.mxu2 %v837_v35 }
 0x1bc   :  { %863 = vmatpush.msrb.mxu0 %v792_v47  ;;  %1034 = vmatpush.msrb.mxu3 %v792_v47 }
 0x1bd   :  { %1191 = vmatpush.msra.mxu2 %v834_v38  ;;  %v1009_v38 = vld [vmem:[#allocation13 + $0x170] sm:$0xff] }
 0x1be   :  { %1039 = vmatpush.msra.mxu0 %v1009_v38  ;;  %1210 = vmatpush.msra.mxu3 %v1009_v38 }
 0x1bf   :  { %1192 = vmatpush.msra.mxu2 %v831_v41  ;;  %v2121_v41 = vld [vmem:[#allocation13 + $0x178] sm:$0xff] }
 0x1c0   :  { %1059 = vmatpush.msra.mxu1 %v2121_v41 }
 0x1c1   :  { %1193 = vmatpush.msra.mxu2 %v828_v43  ;;  %v1006_v43 = vld [vmem:[#allocation13 + $0x158] sm:$0xff] }
 0x1c2   :  { %1040 = vmatpush.msra.mxu0 %v1006_v43  ;;  %1060 = vmatpush.msra.mxu1 %v2124_v45 }
 0x1c3   :  { %1194 = vmatpush.msra.mxu2 %v825_v10  ;;  %v2127_v10 = vld [vmem:[#allocation13 + $0x148] sm:$0xff]  ;;  %1211 = vmatpush.msra.mxu3 %v1006_v43 }
 0x1c4   :  { %1061 = vmatpush.msra.mxu1 %v2127_v10 }
 0x1c5   :  { %1195 = vmatpush.msra.mxu2 %v822_v16  ;;  %v2130_v16 = vld [vmem:[#allocation13 + $0x130] sm:$0xff] }
 0x1c6   :  { %1062 = vmatpush.msra.mxu1 %v2130_v16 }
 0x1c7   :  { %1196 = vmatpush.msra.mxu2 %v819_v20  ;;  %v2132_v20 = vld [vmem:[#allocation15] sm:$0x7] }
 0x1c9   :  { %1197 = vmatpush.msra.mxu2 %v816_v32  ;;  %v842_v32 = vperm.slane %v2132_v20, 0 }
 0x1cb   :  { %1198 = vmatpush.msra.mxu2 %v813_v51  ;;  %v2142_v51 = vld [vmem:[#allocation3 + $0x3] ss:$8 sm:$0x7] }
 0x1cd   :  { %1199 = vmatpush.msra.mxu2 %v810_v15  ;;  %v2145_v15 = vld [vmem:[#allocation13 + $0xe8] sm:$0xff] }
 0x1cf   :  { %1200 = vmatpush.msra.mxu2 %v807_v26 }
 0x1d1   :  { %1201 = vmatpush.msra.mxu2 %v804_v31  ;;  %v988_v31 = vld [vmem:[#allocation13 + $0xc8] sm:$0xff] }
 0x1d3   :  { %1202 = vmatpush.msra.mxu2 %v801_v36 }
 0x1d5   :  { %1203 = vmatpush.msra.mxu2 %v798_v39 }
 0x1d7   :  { %1204 = vmatpush.msra.mxu2 %v795_v44  ;;  %v2153_v44 = vld [vmem:[#allocation13 + $0xb8] sm:$0xff] }
 0x1d9   :  { %1205 = vmatpush.msra.mxu2 %v792_v47 }
 0x237   :  { %v694_v24 = vpop.f32.mrf.mxu1 }
 0x238   :  { %v695_v28 = vadd.f32 %v694_v24, %v671_v12  ;;  %v1000_v12 = vld [vmem:[#allocation13 + $0x128] sm:$0xff]  ;;  %v997_v24 = vld [vmem:[#allocation13 + $0x110] sm:$0xff] }
 0x23a   :  { %v737_v40 = vadd.f32 %v695_v28, %v2107_v37  ;;  %v2135_v28 = vld [vmem:[#allocation13 + $0x118] sm:$0xff]  ;;  %v843_v37 = vperm.slane %v2132_v20, 1 }
 0x23b   :  { %1063 = vmatpush.msra.mxu1 %v2135_v28 }
 0x23c   :  { %v1397_v14 = vmul.f32 -1.442695, %v737_v40  ;;  %v994_v40 = vld [vmem:[#allocation13 + $0xf8] sm:$0xff] }
 0x23d   :  { %v714_v18 = vpop.f32.mrf.mxu2 }
 0x23e   :  { %1439 = vpow2.f32 %v1397_v14  ;;  %v715_v21 = vadd.f32 %v714_v18, %v672_v48  ;;  %v734_v60 = vpop.f32.mrf.mxu3  ;;  %v2140_v48 = vld [vmem:[#allocation13 + $0x100] sm:$0xff] }
 0x23f   :  { %v735_v1 = vadd.f32 %v734_v60, %v673_v56  ;;  %1064 = vmatpush.msra.mxu1 %v2140_v48  ;;  %v991_v14 = vld [vmem:[#allocation13 + $0xe0] sm:$0xff]  ;;  %v973_v56 = vld [vmem:[#allocation13 + $0x50] sm:$0xff] }
 0x240   :  { %v760_v29 = vadd.f32 %v758_v23, %v715_v21 }
 0x241   :  { %1065 = vmatpush.msra.mxu1 %v2145_v15 }
 0x242   :  { %v1398_v34 = vmul.f32 -1.442695, %v760_v29  ;;  %v929_v29 = vrot.slane %v2142_v51, 1 }
 0x244   :  { %v1440_v42 = vpop.eup %1439  ;;  %1441 = vpow2.f32 %v1398_v34  ;;  %v2149_v34 = vld [vmem:[#allocation13 + $0xd0] sm:$0xff] }
 0x245   :  { %v741_v46 = vadd.f32 1.0, %v1440_v42  ;;  %1066 = vmatpush.msra.mxu1 %v2149_v34  ;;  %v985_v42 = vld [vmem:[#allocation13 + $0xb0] sm:$0xff] }
 0x247   :  { %1443 = vrcp.f32 %v741_v46  ;;  %v753_v55 = vand.u32 2147483648, %v741_v46  ;;  %v751_v58 = vand.u32 2147483647, %v741_v46  ;;  %vm747_vm1 = vweird.f32 %v741_v46  ;;  %1067 = vmatpush.msra.mxu1 %v2153_v44 }
 0x249   :  { %v754_v63 = vor.u32 1.1754944e-38, %v753_v55  ;;  %vm752_vm3 = vcmp.eq.f32.partialorder %v751_v58, 8.507059e+37  ;;  %v2162_v55 = vld [vmem:[#allocation13 + $0x70] sm:$0xff]  ;;  %v970_v58 = vld [vmem:[#allocation13 + $0x38] sm:$0xff] }
 0x24a   :  { %v1442_v49 = vpop.eup %1441 }
 0x24b   :  { %v764_v52 = vadd.f32 1.0, %v1442_v49  ;;  %v982_v49 = vld [vmem:[#allocation13 + $0x98] sm:$0xff] }
 0x24d   :  { %v1444_v50 = vpop.eup %1443  ;;  %1445 = vrcp.f32 %v764_v52  ;;  %v776_v6 = vand.u32 2147483648, %v764_v52  ;;  %v774_v8 = vand.u32 2147483647, %v764_v52  ;;  %vm770_vm5 = vweird.f32 %v764_v52 }
 0x24e   :  { %v743_v53 = vmul.f32 %v1444_v50, %v741_v46  ;;  %vm748_vm0 = vweird.f32 %v1444_v50 }
 0x24f   :  { %vm749_vm2 = vmor %vm747_vm1, %vm748_vm0  ;;  %v777_v13 = vor.u32 1.1754944e-38, %v776_v6  ;;  %vm775_vm7 = vcmp.eq.f32.partialorder %v774_v8, 8.507059e+37 }
 0x250   :  { %v744_v54 = vsub.f32 1.0, %v743_v53  ;;  %v2159_v53 = vld [vmem:[#allocation13 + $0x88] sm:$0xff] }
 0x252   :  { %v745_v57 = vmul.f32 %v1444_v50, %v744_v54  ;;  %v976_v54 = vld [vmem:[#allocation13 + $0x68] sm:$0xff] }
 0x253   :  { %v1446_v59 = vpop.eup %1445 }
 0x254   :  { %v766_v61 = vmul.f32 %v1446_v59, %v764_v52  ;;  %v746_v62 = vadd.f32 %v1444_v50, %v745_v57  ;;  %vm771_vm4 = vweird.f32 %v1446_v59  ;;  %v2156_v52 = vld [vmem:[#allocation13 + $0xa0] sm:$0xff]  ;;  %v2165_v57 = vld [vmem:[#allocation13 + $0x58] sm:$0xff] }
 0x255   :  { %vm772_vm6 = vmor %vm770_vm5, %vm771_vm4  ;;  %1068 = vmatpush.msra.mxu1 %v2156_v52 }
 0x256   :  { %v767_v0 = vsub.f32 1.0, %v766_v61  ;;  %v750_v2 = vsel %vm749_vm2, %v1444_v50, %v746_v62  ;;  %v979_v50 = vld [vmem:[#allocation13 + $0x80] sm:$0xff]  ;;  %v2170_v62 = vld [vmem:[#allocation13 + $0x28] sm:$0xff] }
 0x257   :  { %v755_v3 = vsel %vm752_vm3, %v754_v63, %v750_v2  ;;  %1069 = vmatpush.msra.mxu1 %v2159_v53  ;;  %v967_v61 = vld [vmem:[#allocation13 + $0x20] sm:$0xff]  ;;  %v964_v2 = vld [vmem:[#allocation13 + $0x8] sm:$0xff] }
 0x258   :  { %v768_v5 = vmul.f32 %v1446_v59, %v767_v0  ;;  %v780_v7 = vmul.f32 %v755_v3, %v735_v1  ;;  %v2173_v3 = vld [vmem:[#allocation13 + $0x10] sm:$0xff] }
 0x259   :  { %1070 = vmatpush.msra.mxu1 %v2162_v55 }
 0x25a   :  { %v769_v9 = vadd.f32 %v1446_v59, %v768_v5  ;;  %v783_v11 = vadd.f32 %v781_v4, %v780_v7 }
 0x25b   :  { %1071 = vmatpush.msra.mxu1 %v2165_v57 }
 0x25c   :  { %v773_v17 = vsel %vm772_vm6, %v1446_v59, %v769_v9  ;;  %1447 = vtanh.f32 %v783_v11  ;;  %v2168_v59 = vld [vmem:[#allocation13 + $0x40] sm:$0xff] }
 0x25d   :  { %v778_v19 = vsel %vm775_vm7, %v777_v13, %v773_v17  ;;  %1072 = vmatpush.msra.mxu1 %v2168_v59  ;;  %v844_v13 = vperm.slane %v2132_v20, 2 }
 0x25e   :  { %v785_v22 = vsub.f32 1.0, %v778_v19  ;;  %v787_v30 = vmul.f32 %v778_v19, %v2098_v33  ;;  %v1003_v33 = vld [vmem:[#allocation13 + $0x140] sm:$0xff] }
 0x25f   :  { %1041 = vmatpush.msra.mxu0 %v1003_v33  ;;  %1212 = vmatpush.msra.mxu3 %v1003_v33 }
 0x260   :  { %1073 = vmatpush.msra.mxu1 %v2170_v62 }
 0x261   :  { %1042 = vmatpush.msra.mxu0 %v1000_v12  ;;  %1213 = vmatpush.msra.mxu3 %v1000_v12  ;;  %v952_v12 = vrot.slane %v2142_v51, 2 }
 0x262   :  { %v1448_v25 = vpop.eup %1447  ;;  %1074 = vmatpush.msra.mxu1 %v2173_v3 }
 0x263   :  { %v786_v27 = vmul.f32 %v1448_v25, %v785_v22  ;;  %1043 = vmatpush.msra.mxu0 %v997_v24  ;;  %1214 = vmatpush.msra.mxu3 %v997_v24 }
 0x265   :  { %v2115_v35 = vadd.f32 %v787_v30, %v786_v27  ;;  %1044 = vmatpush.msra.mxu0 %v994_v40  ;;  %1215 = vmatpush.msra.mxu3 %v994_v40 }
 0x267   :  { %789 = vst [vmem:[#allocation4 + $0x2] sm:$0x1] %v2115_v35  ;;  %864 = vmatmul.f32.vlgmr.msrb.gmra.mxu0 %v2115_v35  ;;  %884 = vmatmul.f32.vlgmr.msrb.gmra.mxu1 %v2115_v35 }
 0x268   :  { %904 = vmatmul.f32.vlgmr.msrb.gmra.mxu2 %v2115_v35  ;;  %1045 = vmatpush.msra.mxu0 %v991_v14 }
 0x269   :  { %1216 = vmatpush.msra.mxu3 %v991_v14 }
 0x26a   :  { %1046 = vmatpush.msra.mxu0 %v988_v31 }
 0x26b   :  { %1217 = vmatpush.msra.mxu3 %v988_v31 }
 0x26c   :  { %1047 = vmatpush.msra.mxu0 %v985_v42 }
 0x26d   :  { %1218 = vmatpush.msra.mxu3 %v985_v42 }
 0x26e   :  { %1048 = vmatpush.msra.mxu0 %v982_v49 }
 0x26f   :  { %1219 = vmatpush.msra.mxu3 %v982_v49 }
 0x270   :  { %1049 = vmatpush.msra.mxu0 %v979_v50 }
 0x271   :  { %1220 = vmatpush.msra.mxu3 %v979_v50 }
 0x272   :  { %1050 = vmatpush.msra.mxu0 %v976_v54 }
 0x273   :  { %1221 = vmatpush.msra.mxu3 %v976_v54 }
 0x274   :  { %1051 = vmatpush.msra.mxu0 %v973_v56 }
 0x275   :  { %1222 = vmatpush.msra.mxu3 %v973_v56 }
 0x276   :  { %1052 = vmatpush.msra.mxu0 %v970_v58 }
 0x277   :  { %1223 = vmatpush.msra.mxu3 %v970_v58 }
 0x278   :  { %1053 = vmatpush.msra.mxu0 %v967_v61 }
 0x279   :  { %1224 = vmatpush.msra.mxu3 %v967_v61 }
 0x27a   :  { %1054 = vmatpush.msra.mxu0 %v964_v2 }
 0x27b   :  { %1225 = vmatpush.msra.mxu3 %v964_v2 }
 0x27c   :  { %1230 = vmatpush.msrb.mxu0 %v2121_v41 }
 0x27e   :  { %1231 = vmatpush.msrb.mxu0 %v2124_v45 }
 0x280   :  { %1232 = vmatpush.msrb.mxu0 %v2127_v10 }
 0x282   :  { %1233 = vmatpush.msrb.mxu0 %v2130_v16 }
 0x284   :  { %1234 = vmatpush.msrb.mxu0 %v2135_v28 }
 0x286   :  { %1235 = vmatpush.msrb.mxu0 %v2140_v48 }
 0x288   :  { %1236 = vmatpush.msrb.mxu0 %v2145_v15  ;;  %v1011_v15 = vld [vmem:[#allocation15] sm:$0x7] }
 0x289   :  { %v1013_v31 = vperm.slane %v1011_v15, 0 }
 0x28a   :  { %1237 = vmatpush.msrb.mxu0 %v2149_v34 }
 0x28c   :  { %1238 = vmatpush.msrb.mxu0 %v2153_v44 }
 0x28e   :  { %1239 = vmatpush.msrb.mxu0 %v2156_v52 }
 0x290   :  { %1240 = vmatpush.msrb.mxu0 %v2159_v53 }
 0x292   :  { %1241 = vmatpush.msrb.mxu0 %v2162_v55 }
 0x294   :  { %1242 = vmatpush.msrb.mxu0 %v2165_v57 }
 0x296   :  { %1243 = vmatpush.msrb.mxu0 %v2168_v59  ;;  %v1015_v59 = vperm.slane %v1011_v15, 2 }
 0x298   :  { %1244 = vmatpush.msrb.mxu0 %v2170_v62 }
 0x29a   :  { %1245 = vmatpush.msrb.mxu0 %v2173_v3 }
 0x2e4   :  { %v865_v18 = vpop.f32.mrf.mxu0  ;;  %v885_v21 = vpop.f32.mrf.mxu1 }
 0x2e5   :  { %v866_v23 = vadd.f32 %v865_v18, %v842_v32  ;;  %v886_v26 = vadd.f32 %v885_v21, %v843_v37  ;;  %v1014_v18 = vperm.slane %v1011_v15, 1  ;;  %v962_v21 = vld [vmem:[#allocation3 + $0x4] ss:$8 sm:$0x7] }
 0x2e7   :  { %v908_v36 = vadd.f32 %v866_v23, %v2142_v51  ;;  %v931_v39 = vadd.f32 %v929_v29, %v886_v26  ;;  %v1100_v26 = vrot.slane %v962_v21, 1 }
 0x2e9   :  { %v1399_v46 = vmul.f32 -1.442695, %v908_v36  ;;  %v1400_v47 = vmul.f32 -1.442695, %v931_v39 }
 0x2eb   :  { %1449 = vpow2.f32 %v1399_v46  ;;  %v905_v25 = vpop.f32.mrf.mxu2 }
 0x2ec   :  { %1451 = vpow2.f32 %v1400_v47  ;;  %v906_v38 = vadd.f32 %v905_v25, %v844_v13 }
 0x2f1   :  { %v1450_v60 = vpop.eup %1449 }
 0x2f2   :  { %v1452_v63 = vpop.eup %1451  ;;  %v912_v0 = vadd.f32 1.0, %v1450_v60 }
 0x2f3   :  { %v935_v1 = vadd.f32 1.0, %v1452_v63 }
 0x2f4   :  { %1453 = vrcp.f32 %v912_v0  ;;  %v924_v11 = vand.u32 2147483648, %v912_v0  ;;  %v922_v19 = vand.u32 2147483647, %v912_v0  ;;  %vm918_vm9 = vweird.f32 %v912_v0 }
 0x2f5   :  { %1455 = vrcp.f32 %v935_v1  ;;  %v947_v33 = vand.u32 2147483648, %v935_v1  ;;  %vm941_vm13 = vweird.f32 %v935_v1  ;;  %v945_v16 = vand.u32 2147483647, %v935_v1 }
 0x2f6   :  { %v925_v30 = vor.u32 1.1754944e-38, %v924_v11  ;;  %vm923_vm11 = vcmp.eq.f32.partialorder %v922_v19, 8.507059e+37 }
 0x2f7   :  { %v948_v28 = vor.u32 1.1754944e-38, %v947_v33  ;;  %vm946_vm15 = vcmp.eq.f32.partialorder %v945_v16, 8.507059e+37  ;;  %v1318_v16 = vld [vmem:[#allocation16 + $0x68] sm:$0xff] }
 0x2fa   :  { %v1454_v4 = vpop.eup %1453 }
 0x2fb   :  { %v1456_v5 = vpop.eup %1455  ;;  %v914_v6 = vmul.f32 %v1454_v4, %v912_v0  ;;  %vm919_vm8 = vweird.f32 %v1454_v4 }
 0x2fc   :  { %v937_v7 = vmul.f32 %v1456_v5, %v935_v1  ;;  %vm920_vm10 = vmor %vm918_vm9, %vm919_vm8  ;;  %vm942_vm12 = vweird.f32 %v1456_v5 }
 0x2fd   :  { %v915_v8 = vsub.f32 1.0, %v914_v6  ;;  %vm943_vm14 = vmor %vm941_vm13, %vm942_vm12 }
 0x2fe   :  { %v938_v9 = vsub.f32 1.0, %v937_v7  ;;  %v1123_v7 = vrot.slane %v962_v21, 2 }
 0x2ff   :  { %v916_v17 = vmul.f32 %v1454_v4, %v915_v8 }
 0x300   :  { %v939_v22 = vmul.f32 %v1456_v5, %v938_v9 }
 0x301   :  { %v917_v27 = vadd.f32 %v1454_v4, %v916_v17 }
 0x302   :  { %v940_v45 = vadd.f32 %v1456_v5, %v939_v22 }
 0x303   :  { %v921_v41 = vsel %vm920_vm10, %v1454_v4, %v917_v27 }
 0x304   :  { %v926_v43 = vsel %vm923_vm11, %v925_v30, %v921_v41  ;;  %v944_v24 = vsel %vm943_vm14, %v1456_v5, %v940_v45  ;;  %v1320_v41 = vld [vmem:[#allocation16 + $0x78] sm:$0xff] }
 0x305   :  { %v951_v10 = vmul.f32 %v926_v43, %v906_v38  ;;  %v949_v32 = vsel %vm946_vm15, %v948_v28, %v944_v24  ;;  %v2209_v43 = vld [vmem:[#allocation15] sm:$0x7]  ;;  %1325 = vmatpush.msrb.mxu1 %v1320_v41 }
 0x306   :  { %v956_v37 = vsub.f32 1.0, %v949_v32  ;;  %v958_v51 = vmul.f32 %v949_v32, %v2115_v35  ;;  %v1184_v45 = vperm.slane %v2209_v43, 0  ;;  %v1185_v33 = vperm.slane %v2209_v43, 1 }
 0x307   :  { %v954_v20 = vadd.f32 %v952_v12, %v951_v10  ;;  %v1319_v10 = vld [vmem:[#allocation16 + $0x70] sm:$0xff] }
 0x308   :  { %v2213_v12 = vld [vmem:[#allocation3 + $0x5] ss:$8 sm:$0x7]  ;;  %1326 = vmatpush.msrb.mxu1 %v1319_v10 }
 0x309   :  { %1457 = vtanh.f32 %v954_v20 }
 0x30a   :  { %1327 = vmatpush.msrb.mxu1 %v1318_v16 }
 0x30f   :  { %v1458_v40 = vpop.eup %1457 }
 0x310   :  { %v957_v48 = vmul.f32 %v1458_v40, %v956_v37  ;;  %v1271_v37 = vrot.slane %v2213_v12, 1  ;;  %v1317_v40 = vld [vmem:[#allocation16 + $0x60] sm:$0xff] }
 0x311   :  { %1328 = vmatpush.msrb.mxu1 %v1317_v40 }
 0x312   :  { %v2194_v14 = vadd.f32 %v958_v51, %v957_v48 }
 0x314   :  { %960 = vst [vmem:[#allocation4 + $0x3] sm:$0x1] %v2194_v14  ;;  %1035 = vmatmul.f32.vlgmr.msrb.gmra.mxu3 %v2194_v14  ;;  %1055 = vmatmul.f32.vlgmr.msra.gmra.mxu0 %v2194_v14 }
 0x315   :  { %1075 = vmatmul.f32.vlgmr.msra.gmra.mxu1 %v2194_v14 }
 0x391   :  { %v1056_v35 = vpop.f32.mrf.mxu0 }
 0x392   :  { %v1057_v23 = vadd.f32 %v1056_v35, %v1014_v18  ;;  %v1076_v63 = vpop.f32.mrf.mxu1  ;;  %v1314_v35 = vld [vmem:[#allocation16 + $0x48] sm:$0xff] }
 0x393   :  { %v1077_v2 = vadd.f32 %v1076_v63, %v1015_v59  ;;  %v1186_v59 = vperm.slane %v2209_v43, 2 }
 0x394   :  { %v1102_v29 = vadd.f32 %v1100_v26, %v1057_v23  ;;  %v1313_v23 = vld [vmem:[#allocation16 + $0x40] sm:$0xff]  ;;  %v1312_v26 = vld [vmem:[#allocation16 + $0x38] sm:$0xff] }
 0x396   :  { %v1402_v34 = vmul.f32 -1.442695, %v1102_v29 }
 0x397   :  { %v1036_v36 = vpop.f32.mrf.mxu3 }
 0x398   :  { %1459 = vpow2.f32 %v1402_v34  ;;  %v1037_v39 = vadd.f32 %v1036_v36, %v1013_v31  ;;  %v1311_v31 = vld [vmem:[#allocation16 + $0x30] sm:$0xff] }
 0x39a   :  { %v1079_v42 = vadd.f32 %v1037_v39, %v962_v21  ;;  %v1315_v21 = vld [vmem:[#allocation16 + $0x50] sm:$0xff] }
 0x39c   :  { %v1401_v44 = vmul.f32 -1.442695, %v1079_v42  ;;  %v1310_v42 = vld [vmem:[#allocation16 + $0x28] sm:$0xff] }
 0x39e   :  { %v1460_v46 = vpop.eup %1459  ;;  %1461 = vpow2.f32 %v1401_v44  ;;  %v1309_v44 = vld [vmem:[#allocation16 + $0x20] sm:$0xff] }
 0x39f   :  { %v1106_v47 = vadd.f32 1.0, %v1460_v46  ;;  %v1308_v46 = vld [vmem:[#allocation16 + $0x18] sm:$0xff] }
 0x3a1   :  { %1463 = vrcp.f32 %v1106_v47  ;;  %v1118_v6 = vand.u32 2147483648, %v1106_v47  ;;  %vm1112_vm5 = vweird.f32 %v1106_v47  ;;  %v1116_v9 = vand.u32 2147483647, %v1106_v47 }
 0x3a3   :  { %v1119_v17 = vor.u32 1.1754944e-38, %v1118_v6  ;;  %vm1117_vm7 = vcmp.eq.f32.partialorder %v1116_v9, 8.507059e+37 }
 0x3a4   :  { %v1462_v49 = vpop.eup %1461 }
 0x3a5   :  { %v1083_v52 = vadd.f32 1.0, %v1462_v49  ;;  %v1306_v49 = vld [vmem:[#allocation16 + $0x8] sm:$0xff] }
 0x3a7   :  { %1465 = vrcp.f32 %v1083_v52  ;;  %v1464_v50 = vpop.eup %1463  ;;  %v1095_v58 = vand.u32 2147483648, %v1083_v52  ;;  %v1093_v61 = vand.u32 2147483647, %v1083_v52  ;;  %vm1089_vm1 = vweird.f32 %v1083_v52 }
 0x3a8   :  { %v1108_v53 = vmul.f32 %v1464_v50, %v1106_v47  ;;  %vm1113_vm4 = vweird.f32 %v1464_v50  ;;  %v1307_v47 = vld [vmem:[#allocation16 + $0x10] sm:$0xff] }
 0x3a9   :  { %v1096_v1 = vor.u32 1.1754944e-38, %v1095_v58  ;;  %vm1094_vm3 = vcmp.eq.f32.partialorder %v1093_v61, 8.507059e+37  ;;  %vm1114_vm6 = vmor %vm1112_vm5, %vm1113_vm4 }
 0x3aa   :  { %v1109_v56 = vsub.f32 1.0, %v1108_v53 }
 0x3ac   :  { %v1110_v62 = vmul.f32 %v1464_v50, %v1109_v56 }
 0x3ad   :  { %v1466_v54 = vpop.eup %1465 }
 0x3ae   :  { %v1085_v55 = vmul.f32 %v1466_v54, %v1083_v52  ;;  %vm1090_vm0 = vweird.f32 %v1466_v54  ;;  %v1111_v5 = vadd.f32 %v1464_v50, %v1110_v62 }
 0x3af   :  { %vm1091_vm2 = vmor %vm1089_vm1, %vm1090_vm0 }
 0x3b0   :  { %v1086_v57 = vsub.f32 1.0, %v1085_v55  ;;  %v1115_v13 = vsel %vm1114_vm6, %v1464_v50, %v1111_v5 }
 0x3b1   :  { %v1120_v19 = vsel %vm1117_vm7, %v1119_v17, %v1115_v13 }
 0x3b2   :  { %v1087_v60 = vmul.f32 %v1466_v54, %v1086_v57  ;;  %v1127_v22 = vsub.f32 1.0, %v1120_v19  ;;  %v1129_v30 = vmul.f32 %v1120_v19, %v2194_v14  ;;  %v1316_v14 = vld [vmem:[#allocation16 + $0x58] sm:$0xff] }
 0x3b3   :  { %1329 = vmatpush.msrb.mxu1 %v1316_v14 }
 0x3b4   :  { %v1088_v0 = vadd.f32 %v1466_v54, %v1087_v60 }
 0x3b5   :  { %1330 = vmatpush.msrb.mxu1 %v1315_v21 }
 0x3b6   :  { %v1092_v3 = vsel %vm1091_vm2, %v1466_v54, %v1088_v0  ;;  %v1305_v54 = vld [vmem:[#allocation16] sm:$0xff] }
 0x3b7   :  { %v1097_v4 = vsel %vm1094_vm3, %v1096_v1, %v1092_v3  ;;  %1331 = vmatpush.msrb.mxu1 %v1314_v35 }
 0x3b8   :  { %v1122_v8 = vmul.f32 %v1097_v4, %v1077_v2 }
 0x3b9   :  { %1332 = vmatpush.msrb.mxu1 %v1313_v23 }
 0x3ba   :  { %v1125_v11 = vadd.f32 %v1123_v7, %v1122_v8  ;;  %v1294_v7 = vrot.slane %v2213_v12, 2 }
 0x3bb   :  { %1333 = vmatpush.msrb.mxu1 %v1312_v26 }
 0x3bc   :  { %1467 = vtanh.f32 %v1125_v11 }
 0x3bd   :  { %1334 = vmatpush.msrb.mxu1 %v1311_v31 }
 0x3bf   :  { %1335 = vmatpush.msrb.mxu1 %v1310_v42 }
 0x3c1   :  { %1336 = vmatpush.msrb.mxu1 %v1309_v44 }
 0x3c2   :  { %v1468_v25 = vpop.eup %1467 }
 0x3c3   :  { %v1128_v27 = vmul.f32 %v1468_v25, %v1127_v22  ;;  %1337 = vmatpush.msrb.mxu1 %v1308_v46 }
 0x3c5   :  { %v2203_v38 = vadd.f32 %v1129_v30, %v1128_v27  ;;  %1338 = vmatpush.msrb.mxu1 %v1307_v47 }
 0x3c7   :  { %1131 = vst [vmem:[#allocation4 + $0x4] sm:$0x1] %v2203_v38  ;;  %1206 = vmatmul.f32.vlgmr.msra.gmra.mxu2 %v2203_v38  ;;  %1226 = vmatmul.f32.vlgmr.msra.gmra.mxu3 %v2203_v38 }
 0x3c8   :  { %1246 = vmatmul.f32.vlgmr.msrb.gmra.mxu0 %v2203_v38  ;;  %1339 = vmatpush.msrb.mxu1 %v1306_v49 }
 0x3ca   :  { %1340 = vmatpush.msrb.mxu1 %v1305_v54 }
 0x445   :  { %v1247_v62 = vpop.f32.mrf.mxu0 }
 0x446   :  { %v1248_v2 = vadd.f32 %v1247_v62, %v1186_v59 }
 0x44a   :  { %v1207_v20 = vpop.f32.mrf.mxu2  ;;  %v1227_v24 = vpop.f32.mrf.mxu3 }
 0x44b   :  { %v1208_v28 = vadd.f32 %v1207_v20, %v1184_v45  ;;  %v1228_v32 = vadd.f32 %v1227_v24, %v1185_v33  ;;  %v1418_v45 = vld [vmem:[%s2237_s8] ss:$0 sm:$0xff] }
 0x44d   :  { %v1250_v48 = vadd.f32 %v1208_v28, %v2213_v12  ;;  %v1273_v51 = vadd.f32 %v1271_v37, %v1228_v32 }
 0x44f   :  { %v1403_v15 = vmul.f32 -1.442695, %v1250_v48  ;;  %v1404_v18 = vmul.f32 -1.442695, %v1273_v51 }
 0x451   :  { %1469 = vpow2.f32 %v1403_v15 }
 0x452   :  { %1471 = vpow2.f32 %v1404_v18 }
 0x457   :  { %v1470_v29 = vpop.eup %1469 }
 0x458   :  { %v1472_v34 = vpop.eup %1471  ;;  %v1254_v36 = vadd.f32 1.0, %v1470_v29 }
 0x459   :  { %v1277_v39 = vadd.f32 1.0, %v1472_v34 }
 0x45a   :  { %1473 = vrcp.f32 %v1254_v36  ;;  %v1266_v57 = vand.u32 2147483648, %v1254_v36  ;;  %v1264_v61 = vand.u32 2147483647, %v1254_v36  ;;  %vm1260_vm9 = vweird.f32 %v1254_v36 }
 0x45b   :  { %1475 = vrcp.f32 %v1277_v39  ;;  %v1289_v8 = vand.u32 2147483648, %v1277_v39  ;;  %vm1283_vm13 = vweird.f32 %v1277_v39  ;;  %v1287_v9 = vand.u32 2147483647, %v1277_v39 }
 0x45c   :  { %v1267_v1 = vor.u32 1.1754944e-38, %v1266_v57  ;;  %vm1265_vm11 = vcmp.eq.f32.partialorder %v1264_v61, 8.507059e+37 }
 0x45d   :  { %v1290_v17 = vor.u32 1.1754944e-38, %v1289_v8  ;;  %vm1288_vm15 = vcmp.eq.f32.partialorder %v1287_v9, 8.507059e+37 }
 0x460   :  { %v1474_v52 = vpop.eup %1473 }
 0x461   :  { %v1476_v50 = vpop.eup %1475  ;;  %v1256_v53 = vmul.f32 %v1474_v52, %v1254_v36  ;;  %vm1261_vm8 = vweird.f32 %v1474_v52 }
 0x462   :  { %v1279_v55 = vmul.f32 %v1476_v50, %v1277_v39  ;;  %vm1262_vm10 = vmor %vm1260_vm9, %vm1261_vm8  ;;  %vm1284_vm12 = vweird.f32 %v1476_v50 }
 0x463   :  { %v1257_v56 = vsub.f32 1.0, %v1256_v53  ;;  %vm1285_vm14 = vmor %vm1283_vm13, %vm1284_vm12 }
 0x464   :  { %v1280_v58 = vsub.f32 1.0, %v1279_v55 }
 0x465   :  { %v1258_v60 = vmul.f32 %v1474_v52, %v1257_v56 }
 0x466   :  { %v1281_v63 = vmul.f32 %v1476_v50, %v1280_v58 }
 0x467   :  { %v1259_v0 = vadd.f32 %v1474_v52, %v1258_v60 }
 0x468   :  { %v1282_v5 = vadd.f32 %v1476_v50, %v1281_v63 }
 0x469   :  { %v1263_v3 = vsel %vm1262_vm10, %v1474_v52, %v1259_v0 }
 0x46a   :  { %v1268_v4 = vsel %vm1265_vm11, %v1267_v1, %v1263_v3  ;;  %v1286_v13 = vsel %vm1285_vm14, %v1476_v50, %v1282_v5 }
 0x46b   :  { %v1293_v6 = vmul.f32 %v1268_v4, %v1248_v2  ;;  %v1291_v19 = vsel %vm1288_vm15, %v1290_v17, %v1286_v13 }
 0x46c   :  { %v1298_v22 = vsub.f32 1.0, %v1291_v19  ;;  %v1300_v30 = vmul.f32 %v1291_v19, %v2203_v38 }
 0x46d   :  { %v1296_v11 = vadd.f32 %v1294_v7, %v1293_v6 }
 0x46f   :  { %1477 = vtanh.f32 %v1296_v11 }
 0x475   :  { %v1478_v25 = vpop.eup %1477 }
 0x476   :  { %v1299_v27 = vmul.f32 %v1478_v25, %v1298_v22 }
 0x478   :  { %v1301_v41 = vadd.f32 %v1300_v30, %v1299_v27 }
 0x47a   :  { %1302 = vst [vmem:[#allocation4 + $0x5] sm:$0x1] %v1301_v41 }
 0x47b   :  { %1303 = vst [vmem:[#allocation19] sm:$0x1] %v1301_v41 }
 0x47c   :  { %1367 = dma.vmem_to_hbm [thread:$0]  %s1363_s16, 16, %s1365_s18, [#allocation20]  }
 0x481   :  { %v1304_v43 = vld [vmem:[#allocation4] sm:$0x3f] }
 0x482   :  { %1341 = vmatmul.f32.vlgmr.msrb.gmra.mxu1 %v1304_v43 }
 0x4ff   :  { %v1342_v38 = vpop.f32.mrf.mxu1 }
 0x500   :  { %v1343_v33 = vadd.f32 %v1418_v45, %v1342_v38 }
 0x502   :  { %1345 = vst [vmem:[#allocation18] sm:$0x3f] %v1343_v33 }
 0x503   :  { %1356 = dma.vmem_to_hbm [thread:$0]  %s1352_s21, 128, %s1354_s3, [#allocation9]  }
 0x504   :  { %1693 = dma.done.wait [#allocation9], 128  }
 0x505   :  { %1694 = vsyncadd [#allocation9], 4294967168 }
 0x506   :  { %1695 = dma.done.wait [#allocation20], 16  }
 0x507   :  { %1696 = vsyncadd [#allocation20], 4294967280 }
 0x508   :  { %1376 = vsyncpa [#allocation8], 1 }
 0x509   :  { %1377 = vsyncpa [#allocation11], 1 }
 0x50a   :  { %1378 = vsyncpa [#allocation14], 1 }
 0x50b   :  { %1379 = vsyncpa [#allocation17], 1 }
 0x50c   :  { %1380 = vsyncpa [#allocation9], 1 }
 0x50d   :  { %1381 = vsyncpa [#allocation20], 1 }

</bundles_post_ra>
